<compile_context>
chip_gen: v7x
topology: tpu7x:2x2x1
jax: 0.10.0
libtpu: 0.0.40
codegen_flags: <defaults>
</compile_context>

<pallas_src>
import functools

import jax
import jax.numpy as jnp
from jax import lax
from jax.experimental import pallas as pl
from jax.experimental.pallas import tpu as pltpu

EPS = 1e-5
F32 = jnp.float32


def _silu(x):
    return x * (1.0 / (1.0 + jnp.exp(-x)))


def _round_up(n, m):
    return (n + m - 1) // m * m


def _pick_bblk(B, HW):
    """Images per grid step: amortize the ~0.35us/step overhead for small
    images, but keep the 'parallel' grid extent even when possible so both
    v7x TensorCores stay busy."""
    bblk = max(1, min(B, max(1, 2048 // HW)))
    while B % bblk:
        bblk -= 1
    if bblk > 1 and bblk % 2 == 0 and (B // bblk) % 2 == 1:
        bblk //= 2
    return bblk


def _cparams(block_bytes, scratch_bytes=0):
    """Explicit VMEM budget (2x blocks for double-buffering) so production
    shapes stay inside v7x's 64 MiB/TC."""
    est = 2 * block_bytes + scratch_bytes + (4 << 20)
    return pltpu.CompilerParams(
        dimension_semantics=("parallel",),
        vmem_limit_bytes=int(min(max(est, 32 << 20), 64 << 20)))


def _tap_masks(H, W):
    """Validity masks (1, H*W) for the 9 taps of a 'same' 3x3 conv on a
    row-major flattened image; generated in-kernel from iota."""
    HW = H * W
    pos = lax.broadcasted_iota(jnp.int32, (1, HW), 1)
    col = pos % W
    row_ok = {-1: pos >= W, 0: None, 1: pos < HW - W}
    col_ok = {-1: col >= 1, 0: None, 1: col <= W - 2}
    masks = []
    for k in range(9):
        dy, dx = k // 3 - 1, k % 3 - 1
        m = None
        for part in (row_ok[dy], col_ok[dx]):
            if part is not None:
                m = part if m is None else jnp.logical_and(m, part)
        masks.append(m)
    return masks


def _conv3x3(x, w_ref, b_ref, slab_ref, cp, H, W, masks):
    """3x3 'same' conv of one flat (cp, H*W) image as a single MXU matmul.

    The 9 taps are lane rolls (XLU) of the flat image, masked at the image
    border, and packed along the contraction axis of a VMEM im2col slab, so
    the conv is (Cout, 9*cp) @ (9*cp, HW) with f32 accumulation in the MXU.
    """
    HW = H * W
    for k in range(9):
        dy, dx = k // 3 - 1, k % 3 - 1
        d = dy * W + dx
        tap = pltpu.roll(x, (-d) % HW, 1) if d else x
        if masks[k] is not None:
            tap = jnp.where(masks[k], tap, 0.0)
        slab_ref[k * cp:(k + 1) * cp, :] = tap.astype(slab_ref.dtype)
    return jnp.dot(w_ref[...], slab_ref[...],
                   preferred_element_type=F32) + b_ref[...]


# kernel 1: conv1 + bias, per-image sum / sum-of-squares for BN1
def _k1_conv1(x_ref, w_ref, b_ref, h_ref, s_ref, sq_ref, slab_ref,
              *, H, W, bblk, cp):
    masks = _tap_masks(H, W)
    for i in range(bblk):
        h = _conv3x3(x_ref[i].astype(F32), w_ref, b_ref, slab_ref,
                     cp, H, W, masks)
        h_ref[i] = h.astype(h_ref.dtype)
        s_ref[i] = jnp.sum(h, axis=1, keepdims=True)
        sq_ref[i] = jnp.sum(h * h, axis=1, keepdims=True)


# kernel 2: fused BN1 + t_emb + SiLU, then conv2 + bias, per-image sums (BN2)
def _k2_conv2(h1_ref, a1_ref, off1_ref, w_ref, b_ref,
              h2_ref, s_ref, sq_ref, slab_ref, *, H, W, bblk, cp):
    masks = _tap_masks(H, W)
    a1 = a1_ref[...]
    for i in range(bblk):
        act = _silu(h1_ref[i].astype(F32) * a1 + off1_ref[i])
        h2 = _conv3x3(act, w_ref, b_ref, slab_ref, cp, H, W, masks)
        h2_ref[i] = h2.astype(h2_ref.dtype)
        s_ref[i] = jnp.sum(h2, axis=1, keepdims=True)
        sq_ref[i] = jnp.sum(h2 * h2, axis=1, keepdims=True)


# kernel 3: fused BN2 * SE-scale + final SiLU (per-image (C,1) scale/offset)
def _k3_scale_silu(h2_ref, sc_ref, of_ref, o_ref, *, bblk):
    for i in range(bblk):
        o_ref[i] = _silu(h2_ref[i].astype(F32) * sc_ref[i]
                         + of_ref[i]).astype(o_ref.dtype)


def unet_block_pallas(x_nchw, t, p, *, act_dtype=jnp.bfloat16):
    B, Cin, H, W = x_nchw.shape
    Cout = p["w1"].shape[-1]
    HW = H * W
    N = B * HW                               # BN counts (training-mode stats)
    cp1 = _round_up(Cin, 8)                  # 8-aligned slab rows for conv1
    bblk = _pick_bblk(B, HW)
    grid = (B // bblk,)
    asz = jnp.dtype(act_dtype).itemsize

    # ---- staging: NCHW stays NCHW (channels -> sublanes, H*W -> lanes) -----
    x_flat = x_nchw.reshape(B, Cin, HW).astype(act_dtype)
    if cp1 != Cin:
        x_flat = jnp.pad(x_flat, ((0, 0), (0, cp1 - Cin), (0, 0)))
    w1 = p["w1"].astype(F32)                                  # (3,3,Cin,Cout)
    if cp1 != Cin:
        w1 = jnp.pad(w1, ((0, 0), (0, 0), (0, cp1 - Cin), (0, 0)))
    w1s = jnp.transpose(w1.reshape(9, cp1, Cout), (2, 0, 1)
                        ).reshape(Cout, 9 * cp1).astype(act_dtype)
    w2s = jnp.transpose(p["w2"].astype(F32).reshape(9, Cout, Cout), (2, 0, 1)
                        ).reshape(Cout, 9 * Cout).astype(act_dtype)
    b1c = p["b1"].astype(F32).reshape(Cout, 1)
    b2c = p["b2"].astype(F32).reshape(Cout, 1)

    # ---- kernel 1: conv1 ----------------------------------------------------
    blk1 = (bblk * cp1 * HW + Cout * 9 * cp1 + bblk * Cout * HW) * asz \
        + 3 * bblk * Cout * 4
    h1, s1, sq1 = pl.pallas_call(
        functools.partial(_k1_conv1, H=H, W=W, bblk=bblk, cp=cp1),
        grid=grid,
        in_specs=[
            pl.BlockSpec((bblk, cp1, HW), lambda b: (b, 0, 0)),
            pl.BlockSpec((Cout, 9 * cp1), lambda b: (0, 0)),
            pl.BlockSpec((Cout, 1), lambda b: (0, 0)),
        ],
        out_specs=(
            pl.BlockSpec((bblk, Cout, HW), lambda b: (b, 0, 0)),
            pl.BlockSpec((bblk, Cout, 1), lambda b: (b, 0, 0)),
            pl.BlockSpec((bblk, Cout, 1), lambda b: (b, 0, 0)),
        ),
        out_shape=(
            jax.ShapeDtypeStruct((B, Cout, HW), act_dtype),
            jax.ShapeDtypeStruct((B, Cout, 1), F32),
            jax.ShapeDtypeStruct((B, Cout, 1), F32),
        ),
        scratch_shapes=[pltpu.VMEM((9 * cp1, HW), act_dtype)],
        compiler_params=_cparams(blk1, 9 * cp1 * HW * asz),
    )(x_flat, w1s, b1c)

    # ---- BN1 finalize + time-MLP (O(B*C), XLA), folded to scale/offset ------
    mu1 = jnp.sum(s1, axis=0).reshape(Cout) / N
    var1 = jnp.sum(sq1, axis=0).reshape(Cout) / N - mu1 * mu1
    a1 = p["g1"].astype(F32) * lax.rsqrt(var1 + EPS)
    temb = _silu(t.astype(F32)) @ p["wt"].astype(F32) + p["bt"].astype(F32)
    off1 = (p["be1"].astype(F32) - mu1 * a1)[None, :] + temb        # (B, Cout)
    a1c = a1.reshape(Cout, 1)
    off1c = off1.reshape(B, Cout, 1)

    # ---- kernel 2: BN1 + temb + SiLU, conv2 ---------------------------------
    blk2 = (2 * bblk * Cout * HW + 9 * Cout * Cout) * asz \
        + (2 * Cout + 3 * bblk * Cout) * 4
    h2, s2, sq2 = pl.pallas_call(
        functools.partial(_k2_conv2, H=H, W=W, bblk=bblk, cp=Cout),
        grid=grid,
        in_specs=[
            pl.BlockSpec((bblk, Cout, HW), lambda b: (b, 0, 0)),
            pl.BlockSpec((Cout, 1), lambda b: (0, 0)),
            pl.BlockSpec((bblk, Cout, 1), lambda b: (b, 0, 0)),
            pl.BlockSpec((Cout, 9 * Cout), lambda b: (0, 0)),
            pl.BlockSpec((Cout, 1), lambda b: (0, 0)),
        ],
        out_specs=(
            pl.BlockSpec((bblk, Cout, HW), lambda b: (b, 0, 0)),
            pl.BlockSpec((bblk, Cout, 1), lambda b: (b, 0, 0)),
            pl.BlockSpec((bblk, Cout, 1), lambda b: (b, 0, 0)),
        ),
        out_shape=(
            jax.ShapeDtypeStruct((B, Cout, HW), act_dtype),
            jax.ShapeDtypeStruct((B, Cout, 1), F32),
            jax.ShapeDtypeStruct((B, Cout, 1), F32),
        ),
        scratch_shapes=[pltpu.VMEM((9 * Cout, HW), act_dtype)],
        compiler_params=_cparams(blk2, 9 * Cout * HW * asz),
    )(h1, a1c, off1c, w2s, b2c)

    # ---- BN2 finalize + SE (global-average-pool comes from the conv2 sums) --
    mu2 = jnp.sum(s2, axis=0).reshape(Cout) / N
    var2 = jnp.sum(sq2, axis=0).reshape(Cout) / N - mu2 * mu2
    a2 = p["g2"].astype(F32) * lax.rsqrt(var2 + EPS)
    b2f = p["be2"].astype(F32) - mu2 * a2
    pool = s2.reshape(B, Cout) / HW * a2[None, :] + b2f[None, :]  # GAP of BN2
    z = jnp.maximum(pool @ p["ws1"].astype(F32) + p["bs1"].astype(F32), 0.0)
    y = jax.nn.sigmoid(z @ p["ws2"].astype(F32) + p["bs2"].astype(F32))
    scale = (a2[None, :] * y).reshape(B, Cout, 1)
    offset = (b2f[None, :] * y).reshape(B, Cout, 1)

    # ---- kernel 3: fused BN2 * SE + final SiLU ------------------------------
    blk3 = bblk * Cout * HW * (asz + 4) + 2 * bblk * Cout * 4
    out = pl.pallas_call(
        functools.partial(_k3_scale_silu, bblk=bblk),
        grid=grid,
        in_specs=[
            pl.BlockSpec((bblk, Cout, HW), lambda b: (b, 0, 0)),
            pl.BlockSpec((bblk, Cout, 1), lambda b: (b, 0, 0)),
            pl.BlockSpec((bblk, Cout, 1), lambda b: (b, 0, 0)),
        ],
        out_specs=pl.BlockSpec((bblk, Cout, HW), lambda b: (b, 0, 0)),
        out_shape=jax.ShapeDtypeStruct((B, Cout, HW), F32),
        compiler_params=_cparams(blk3),
    )(h2, scale, offset)

    return out.reshape(B, Cout, H, W)      # already NCHW


def unet_block_reference(x_nchw, t, p):
    """Pure-JAX reference of the PyTorch forward (verification only)."""
    x = jnp.transpose(x_nchw, (0, 2, 3, 1)).astype(jnp.float32)

    def conv(h, w, b):
        return lax.conv_general_dilated(
            h, w, (1, 1), "SAME",
            dimension_numbers=("NHWC", "HWIO", "NHWC"),
            precision=lax.Precision.HIGHEST) + b

    def bn(h, g, be):
        mu = h.mean(axis=(0, 1, 2))
        var = ((h - mu) ** 2).mean(axis=(0, 1, 2))
        return (h - mu) / jnp.sqrt(var + EPS) * g + be

    h = bn(conv(x, p["w1"], p["b1"]), p["g1"], p["be1"])
    temb = jax.nn.silu(t) @ p["wt"] + p["bt"]
    h = jax.nn.silu(h + temb[:, None, None, :])
    h = bn(conv(h, p["w2"], p["b2"]), p["g2"], p["be2"])
    pool = h.mean(axis=(1, 2))
    y = jax.nn.sigmoid(
        jnp.maximum(pool @ p["ws1"] + p["bs1"], 0.0) @ p["ws2"] + p["bs2"])
    h = jax.nn.silu(h * y[:, None, None, :])
    return jnp.transpose(h, (0, 3, 1, 2))


if __name__ == "__main__":
    B, Cin, Cout, H, W, Temb = 2, 4, 32, 16, 16, 32
    reduction = 16
    Chid = Cout // reduction  # 2

    key = jax.random.PRNGKey(0)
    k = jax.random.split(key, 16)
    p = {
        "w1": 0.2 * jax.random.normal(k[0], (3, 3, Cin, Cout), jnp.float32),
        "b1": 0.1 * jax.random.normal(k[1], (Cout,), jnp.float32),
        "wt": 0.2 * jax.random.normal(k[2], (Temb, Cout), jnp.float32),
        "bt": 0.1 * jax.random.normal(k[3], (Cout,), jnp.float32),
        "g1": 1.0 + 0.1 * jax.random.normal(k[4], (Cout,), jnp.float32),
        "be1": 0.1 * jax.random.normal(k[5], (Cout,), jnp.float32),
        "w2": 0.1 * jax.random.normal(k[6], (3, 3, Cout, Cout), jnp.float32),
        "b2": 0.1 * jax.random.normal(k[7], (Cout,), jnp.float32),
        "g2": 1.0 + 0.1 * jax.random.normal(k[8], (Cout,), jnp.float32),
        "be2": 0.1 * jax.random.normal(k[9], (Cout,), jnp.float32),
        "ws1": 0.3 * jax.random.normal(k[10], (Cout, Chid), jnp.float32),
        "bs1": 0.1 * jax.random.normal(k[11], (Chid,), jnp.float32),
        "ws2": 0.3 * jax.random.normal(k[12], (Chid, Cout), jnp.float32),
        "bs2": 0.1 * jax.random.normal(k[13], (Cout,), jnp.float32),
    }
    x = jax.random.normal(k[14], (B, Cin, H, W), jnp.float32)   # NCHW (torch)
    t = jax.random.normal(k[15], (B, Temb), jnp.float32)

    fwd = jax.jit(unet_block_pallas)
    out = jax.block_until_ready(fwd(x, t, p))
    assert out.shape == (B, Cout, H, W)
    assert bool(jnp.all(jnp.isfinite(out)))

    ref = unet_block_reference(x, t, p)
    err = jnp.abs(out - ref)
    max_err = float(jnp.max(err))
    mean_err = float(jnp.mean(err))
    # bf16 HBM round-trips + bf16 MXU operands (f32 accumulation) -> loose tol
    assert max_err < 5e-2 and mean_err < 1e-2, (max_err, mean_err)
    print("KERNEL_OK")
</pallas_src>

<mosaic_0001>
module attributes {stable_mosaic.version = 11 : i64} {
  func.func @_k1_conv1(%arg0: i32, %arg1: memref<1x8x256xbf16, #tpu.memory_space<vmem>>, %arg2: memref<32x72xbf16, #tpu.memory_space<vmem>>, %arg3: memref<32x1xf32, #tpu.memory_space<vmem>>, %arg4: memref<1x32x256xbf16, #tpu.memory_space<vmem>>, %arg5: memref<1x32x1xf32, #tpu.memory_space<vmem>>, %arg6: memref<1x32x1xf32, #tpu.memory_space<vmem>>, %arg7: memref<72x256xbf16, #tpu.memory_space<vmem>>) attributes {dimension_semantics = [#tpu.dimension_semantics<parallel>], iteration_bounds = array<i64: 2>, scalar_prefetch = 0 : i64, scratch_operands = 1 : i64, tpu.core_type = #tpu.core_type<tc>, window_params = [{transform_indices = @transform_0, window_bounds = array<i64: 1, 8, 256>}, {pipeline_mode = #tpu.pipeline_mode<synchronous>, transform_indices = @transform_1, window_bounds = array<i64: 32, 72>}, {pipeline_mode = #tpu.pipeline_mode<synchronous>, transform_indices = @transform_2, window_bounds = array<i64: 32, 1>}, {transform_indices = @transform_3, window_bounds = array<i64: 1, 32, 256>}, {transform_indices = @transform_4, window_bounds = array<i64: 1, 32, 1>}, {transform_indices = @transform_5, window_bounds = array<i64: 1, 32, 1>}]} {
    %0 = tpu.iota {dimensions = array<i32: 1>} : vector<1x256xi32>
    %c16_i32 = arith.constant 16 : i32
    %c0_i32 = arith.constant 0 : i32
    %1 = arith.cmpi eq, %c16_i32, %c0_i32 : i32
    %c1_i32 = arith.constant 1 : i32
    %2 = arith.select %1, %c1_i32, %c16_i32 : i32
    %3 = vector.broadcast %2 : i32 to vector<1x256xi32>
    %4 = arith.remsi %0, %3 : vector<1x256xi32>
    %c0_i32_0 = arith.constant 0 : i32
    %5 = vector.broadcast %c0_i32_0 : i32 to vector<1x256xi32>
    %6 = arith.cmpi ne, %4, %5 : vector<1x256xi32>
    %c0_i32_1 = arith.constant 0 : i32
    %7 = vector.broadcast %c0_i32_1 : i32 to vector<1x256xi32>
    %8 = arith.cmpi slt, %4, %7 : vector<1x256xi32>
    %c0_i32_2 = arith.constant 0 : i32
    %9 = arith.cmpi slt, %2, %c0_i32_2 : i32
    %10 = vector.broadcast %9 : i1 to vector<1x256xi1>
    %11 = vector.broadcast %10 : vector<1x256xi1> to vector<1x256xi1>
    %12 = arith.xori %8, %11 : vector<1x256xi1>
    %13 = arith.andi %12, %6 : vector<1x256xi1>
    %14 = vector.broadcast %2 : i32 to vector<1x256xi32>
    %15 = arith.addi %4, %14 : vector<1x256xi32>
    %16 = arith.select %13, %15, %4 : vector<1x256xi1>, vector<1x256xi32>
    %c16_i32_3 = arith.constant 16 : i32
    %17 = vector.broadcast %c16_i32_3 : i32 to vector<1x256xi32>
    %18 = arith.cmpi sge, %0, %17 : vector<1x256xi32>
    %c240_i32 = arith.constant 240 : i32
    %19 = vector.broadcast %c240_i32 : i32 to vector<1x256xi32>
    %20 = arith.cmpi slt, %0, %19 : vector<1x256xi32>
    %c1_i32_4 = arith.constant 1 : i32
    %21 = vector.broadcast %c1_i32_4 : i32 to vector<1x256xi32>
    %22 = arith.cmpi sge, %16, %21 : vector<1x256xi32>
    %c14_i32 = arith.constant 14 : i32
    %23 = vector.broadcast %c14_i32 : i32 to vector<1x256xi32>
    %24 = arith.cmpi sle, %16, %23 : vector<1x256xi32>
    %25 = arith.andi %18, %22 : vector<1x256xi1>
    %26 = arith.andi %18, %24 : vector<1x256xi1>
    %27 = arith.andi %20, %22 : vector<1x256xi1>
    %28 = arith.andi %20, %24 : vector<1x256xi1>
    %c0 = arith.constant 0 : index
    %c0_5 = arith.constant 0 : index
    %c0_6 = arith.constant 0 : index
    %29 = vector.load %arg1[%c0, %c0_5, %c0_6] : memref<1x8x256xbf16, #tpu.memory_space<vmem>>, vector<1x8x256xbf16>
    %30 = vector.shape_cast %29 : vector<1x8x256xbf16> to vector<8x256xbf16>
    %31 = arith.extf %30 : vector<8x256xbf16> to vector<8x256xf32>
    %c17_i32 = arith.constant 17 : i32
    %32 = tpu.dynamic_rotate %31 by %c17_i32 dim 1 : vector<8x256xf32>, i32 -> vector<8x256xf32>
    %cst = arith.constant 0.000000e+00 : f32
    %33 = vector.shape_cast %25 : vector<1x256xi1> to vector<1x256xi1>
    %34 = vector.broadcast %33 : vector<1x256xi1> to vector<8x256xi1>
    %35 = vector.broadcast %cst : f32 to vector<8x256xf32>
    %36 = arith.select %34, %32, %35 : vector<8x256xi1>, vector<8x256xf32>
    %37 = arith.truncf %36 : vector<8x256xf32> to vector<8x256xbf16>
    %c0_7 = arith.constant 0 : index
    %c0_8 = arith.constant 0 : index
    %38 = vector.load %arg7[%c0_7, %c0_8] : memref<72x256xbf16, #tpu.memory_space<vmem>>, vector<8x256xbf16>
    tpu.vector_store %arg7[%c0_7, %c0_8], %37 {strides = array<i32>} : memref<72x256xbf16, #tpu.memory_space<vmem>>, vector<8x256xbf16>,
    %c16_i32_9 = arith.constant 16 : i32
    %39 = tpu.dynamic_rotate %31 by %c16_i32_9 dim 1 : vector<8x256xf32>, i32 -> vector<8x256xf32>
    %cst_10 = arith.constant 0.000000e+00 : f32
    %40 = vector.shape_cast %18 : vector<1x256xi1> to vector<1x256xi1>
    %41 = vector.broadcast %40 : vector<1x256xi1> to vector<8x256xi1>
    %42 = vector.broadcast %cst_10 : f32 to vector<8x256xf32>
    %43 = arith.select %41, %39, %42 : vector<8x256xi1>, vector<8x256xf32>
    %44 = arith.truncf %43 : vector<8x256xf32> to vector<8x256xbf16>
    %c8 = arith.constant 8 : index
    %c0_11 = arith.constant 0 : index
    %45 = vector.load %arg7[%c8, %c0_11] : memref<72x256xbf16, #tpu.memory_space<vmem>>, vector<8x256xbf16>
    tpu.vector_store %arg7[%c8, %c0_11], %44 {strides = array<i32>} : memref<72x256xbf16, #tpu.memory_space<vmem>>, vector<8x256xbf16>,
    %c15_i32 = arith.constant 15 : i32
    %46 = tpu.dynamic_rotate %31 by %c15_i32 dim 1 : vector<8x256xf32>, i32 -> vector<8x256xf32>
    %cst_12 = arith.constant 0.000000e+00 : f32
    %47 = vector.shape_cast %26 : vector<1x256xi1> to vector<1x256xi1>
    %48 = vector.broadcast %47 : vector<1x256xi1> to vector<8x256xi1>
    %49 = vector.broadcast %cst_12 : f32 to vector<8x256xf32>
    %50 = arith.select %48, %46, %49 : vector<8x256xi1>, vector<8x256xf32>
    %51 = arith.truncf %50 : vector<8x256xf32> to vector<8x256xbf16>
    %c16 = arith.constant 16 : index
    %c0_13 = arith.constant 0 : index
    %52 = vector.load %arg7[%c16, %c0_13] : memref<72x256xbf16, #tpu.memory_space<vmem>>, vector<8x256xbf16>
    tpu.vector_store %arg7[%c16, %c0_13], %51 {strides = array<i32>} : memref<72x256xbf16, #tpu.memory_space<vmem>>, vector<8x256xbf16>,
    %c1_i32_14 = arith.constant 1 : i32
    %53 = tpu.dynamic_rotate %31 by %c1_i32_14 dim 1 : vector<8x256xf32>, i32 -> vector<8x256xf32>
    %cst_15 = arith.constant 0.000000e+00 : f32
    %54 = vector.shape_cast %22 : vector<1x256xi1> to vector<1x256xi1>
    %55 = vector.broadcast %54 : vector<1x256xi1> to vector<8x256xi1>
    %56 = vector.broadcast %cst_15 : f32 to vector<8x256xf32>
    %57 = arith.select %55, %53, %56 : vector<8x256xi1>, vector<8x256xf32>
    %58 = arith.truncf %57 : vector<8x256xf32> to vector<8x256xbf16>
    %c24 = arith.constant 24 : index
    %c0_16 = arith.constant 0 : index
    %59 = vector.load %arg7[%c24, %c0_16] : memref<72x256xbf16, #tpu.memory_space<vmem>>, vector<8x256xbf16>
    tpu.vector_store %arg7[%c24, %c0_16], %58 {strides = array<i32>} : memref<72x256xbf16, #tpu.memory_space<vmem>>, vector<8x256xbf16>,
    %60 = arith.truncf %31 : vector<8x256xf32> to vector<8x256xbf16>
    %c32 = arith.constant 32 : index
    %c0_17 = arith.constant 0 : index
    %61 = vector.load %arg7[%c32, %c0_17] : memref<72x256xbf16, #tpu.memory_space<vmem>>, vector<8x256xbf16>
    tpu.vector_store %arg7[%c32, %c0_17], %60 {strides = array<i32>} : memref<72x256xbf16, #tpu.memory_space<vmem>>, vector<8x256xbf16>,
    %c255_i32 = arith.constant 255 : i32
    %62 = tpu.dynamic_rotate %31 by %c255_i32 dim 1 : vector<8x256xf32>, i32 -> vector<8x256xf32>
    %cst_18 = arith.constant 0.000000e+00 : f32
    %63 = vector.shape_cast %24 : vector<1x256xi1> to vector<1x256xi1>
    %64 = vector.broadcast %63 : vector<1x256xi1> to vector<8x256xi1>
    %65 = vector.broadcast %cst_18 : f32 to vector<8x256xf32>
    %66 = arith.select %64, %62, %65 : vector<8x256xi1>, vector<8x256xf32>
    %67 = arith.truncf %66 : vector<8x256xf32> to vector<8x256xbf16>
    %c40 = arith.constant 40 : index
    %c0_19 = arith.constant 0 : index
    %68 = vector.load %arg7[%c40, %c0_19] : memref<72x256xbf16, #tpu.memory_space<vmem>>, vector<8x256xbf16>
    tpu.vector_store %arg7[%c40, %c0_19], %67 {strides = array<i32>} : memref<72x256xbf16, #tpu.memory_space<vmem>>, vector<8x256xbf16>,
    %c241_i32 = arith.constant 241 : i32
    %69 = tpu.dynamic_rotate %31 by %c241_i32 dim 1 : vector<8x256xf32>, i32 -> vector<8x256xf32>
    %cst_20 = arith.constant 0.000000e+00 : f32
    %70 = vector.shape_cast %27 : vector<1x256xi1> to vector<1x256xi1>
    %71 = vector.broadcast %70 : vector<1x256xi1> to vector<8x256xi1>
    %72 = vector.broadcast %cst_20 : f32 to vector<8x256xf32>
    %73 = arith.select %71, %69, %72 : vector<8x256xi1>, vector<8x256xf32>
    %74 = arith.truncf %73 : vector<8x256xf32> to vector<8x256xbf16>
    %c48 = arith.constant 48 : index
    %c0_21 = arith.constant 0 : index
    %75 = vector.load %arg7[%c48, %c0_21] : memref<72x256xbf16, #tpu.memory_space<vmem>>, vector<8x256xbf16>
    tpu.vector_store %arg7[%c48, %c0_21], %74 {strides = array<i32>} : memref<72x256xbf16, #tpu.memory_space<vmem>>, vector<8x256xbf16>,
    %c240_i32_22 = arith.constant 240 : i32
    %76 = tpu.dynamic_rotate %31 by %c240_i32_22 dim 1 : vector<8x256xf32>, i32 -> vector<8x256xf32>
    %cst_23 = arith.constant 0.000000e+00 : f32
    %77 = vector.shape_cast %20 : vector<1x256xi1> to vector<1x256xi1>
    %78 = vector.broadcast %77 : vector<1x256xi1> to vector<8x256xi1>
    %79 = vector.broadcast %cst_23 : f32 to vector<8x256xf32>
    %80 = arith.select %78, %76, %79 : vector<8x256xi1>, vector<8x256xf32>
    %81 = arith.truncf %80 : vector<8x256xf32> to vector<8x256xbf16>
    %c56 = arith.constant 56 : index
    %c0_24 = arith.constant 0 : index
    %82 = vector.load %arg7[%c56, %c0_24] : memref<72x256xbf16, #tpu.memory_space<vmem>>, vector<8x256xbf16>
    tpu.vector_store %arg7[%c56, %c0_24], %81 {strides = array<i32>} : memref<72x256xbf16, #tpu.memory_space<vmem>>, vector<8x256xbf16>,
    %c239_i32 = arith.constant 239 : i32
    %83 = tpu.dynamic_rotate %31 by %c239_i32 dim 1 : vector<8x256xf32>, i32 -> vector<8x256xf32>
    %cst_25 = arith.constant 0.000000e+00 : f32
    %84 = vector.shape_cast %28 : vector<1x256xi1> to vector<1x256xi1>
    %85 = vector.broadcast %84 : vector<1x256xi1> to vector<8x256xi1>
    %86 = vector.broadcast %cst_25 : f32 to vector<8x256xf32>
    %87 = arith.select %85, %83, %86 : vector<8x256xi1>, vector<8x256xf32>
    %88 = arith.truncf %87 : vector<8x256xf32> to vector<8x256xbf16>
    %c64 = arith.constant 64 : index
    %c0_26 = arith.constant 0 : index
    %89 = vector.load %arg7[%c64, %c0_26] : memref<72x256xbf16, #tpu.memory_space<vmem>>, vector<8x256xbf16>
    tpu.vector_store %arg7[%c64, %c0_26], %88 {strides = array<i32>} : memref<72x256xbf16, #tpu.memory_space<vmem>>, vector<8x256xbf16>,
    %c0_27 = arith.constant 0 : index
    %c0_28 = arith.constant 0 : index
    %90 = vector.load %arg2[%c0_27, %c0_28] : memref<32x72xbf16, #tpu.memory_space<vmem>>, vector<32x72xbf16>
    %c0_29 = arith.constant 0 : index
    %c0_30 = arith.constant 0 : index
    %91 = vector.load %arg7[%c0_29, %c0_30] : memref<72x256xbf16, #tpu.memory_space<vmem>>, vector<72x256xbf16>
    %cst_31 = arith.constant dense<0.000000e+00> : vector<32x256xf32>
    %92 = tpu.matmul %90, %91, %cst_31 {dimension_numbers = #tpu.dot_dimension_numbers<[1], [0], [0], [1], [0, 0, 1, 1], [], []>} : vector<32x72xbf16>, vector<72x256xbf16>, vector<32x256xf32> -> vector<32x256xf32>
    %c0_32 = arith.constant 0 : index
    %c0_33 = arith.constant 0 : index
    %93 = vector.load %arg3[%c0_32, %c0_33] : memref<32x1xf32, #tpu.memory_space<vmem>>, vector<32x1xf32>
    %94 = vector.broadcast %93 : vector<32x1xf32> to vector<32x256xf32>
    %95 = arith.addf %92, %94 : vector<32x256xf32>
    %96 = arith.truncf %95 : vector<32x256xf32> to vector<32x256xbf16>
    %c0_34 = arith.constant 0 : index
    %c0_35 = arith.constant 0 : index
    %c0_36 = arith.constant 0 : index
    %97 = vector.load %arg4[%c0_34, %c0_35, %c0_36] : memref<1x32x256xbf16, #tpu.memory_space<vmem>>, vector<1x32x256xbf16>
    %98 = vector.shape_cast %97 : vector<1x32x256xbf16> to vector<32x256xbf16>
    %99 = vector.shape_cast %96 : vector<32x256xbf16> to vector<1x32x256xbf16>
    tpu.vector_store %arg4[%c0_34, %c0_35, %c0_36], %99 {strides = array<i32>} : memref<1x32x256xbf16, #tpu.memory_space<vmem>>, vector<1x32x256xbf16>,
    %cst_37 = arith.constant dense<0.000000e+00> : vector<32xf32>
    %100 = vector.multi_reduction <add>, %95, %cst_37 [1] : vector<32x256xf32> to vector<32xf32>
    %101 = vector.shape_cast %100 : vector<32xf32> to vector<32x1xf32>
    %c0_38 = arith.constant 0 : index
    %c0_39 = arith.constant 0 : index
    %c0_40 = arith.constant 0 : index
    %102 = vector.load %arg5[%c0_38, %c0_39, %c0_40] : memref<1x32x1xf32, #tpu.memory_space<vmem>>, vector<1x32x1xf32>
    %103 = vector.shape_cast %102 : vector<1x32x1xf32> to vector<32x1xf32>
    %104 = vector.shape_cast %101 : vector<32x1xf32> to vector<1x32x1xf32>
    tpu.vector_store %arg5[%c0_38, %c0_39, %c0_40], %104 {strides = array<i32>} : memref<1x32x1xf32, #tpu.memory_space<vmem>>, vector<1x32x1xf32>,
    %105 = arith.mulf %95, %95 : vector<32x256xf32>
    %cst_41 = arith.constant dense<0.000000e+00> : vector<32xf32>
    %106 = vector.multi_reduction <add>, %105, %cst_41 [1] : vector<32x256xf32> to vector<32xf32>
    %107 = vector.shape_cast %106 : vector<32xf32> to vector<32x1xf32>
    %c0_42 = arith.constant 0 : index
    %c0_43 = arith.constant 0 : index
    %c0_44 = arith.constant 0 : index
    %108 = vector.load %arg6[%c0_42, %c0_43, %c0_44] : memref<1x32x1xf32, #tpu.memory_space<vmem>>, vector<1x32x1xf32>
    %109 = vector.shape_cast %108 : vector<1x32x1xf32> to vector<32x1xf32>
    %110 = vector.shape_cast %107 : vector<32x1xf32> to vector<1x32x1xf32>
    tpu.vector_store %arg6[%c0_42, %c0_43, %c0_44], %110 {strides = array<i32>} : memref<1x32x1xf32, #tpu.memory_space<vmem>>, vector<1x32x1xf32>,
    return
  }
  func.func @transform_0(%arg0: i32) -> (i32, i32, i32) {
    %c0_i32 = arith.constant 0 : i32
    %c0_i32_0 = arith.constant 0 : i32
    %c0_i32_1 = arith.constant 0 : i32
    return %arg0, %c0_i32, %c0_i32_0 : i32, i32, i32
  }
  func.func @transform_1(%arg0: i32) -> (i32, i32) {
    %c0_i32 = arith.constant 0 : i32
    %c0_i32_0 = arith.constant 0 : i32
    %c0_i32_1 = arith.constant 0 : i32
    return %c0_i32, %c0_i32_0 : i32, i32
  }
  func.func @transform_2(%arg0: i32) -> (i32, i32) {
    %c0_i32 = arith.constant 0 : i32
    %c0_i32_0 = arith.constant 0 : i32
    %c0_i32_1 = arith.constant 0 : i32
    return %c0_i32, %c0_i32_0 : i32, i32
  }
  func.func @transform_3(%arg0: i32) -> (i32, i32, i32) {
    %c0_i32 = arith.constant 0 : i32
    %c0_i32_0 = arith.constant 0 : i32
    %c0_i32_1 = arith.constant 0 : i32
    return %arg0, %c0_i32, %c0_i32_0 : i32, i32, i32
  }
  func.func @transform_4(%arg0: i32) -> (i32, i32, i32) {
    %c0_i32 = arith.constant 0 : i32
    %c0_i32_0 = arith.constant 0 : i32
    %c0_i32_1 = arith.constant 0 : i32
    return %arg0, %c0_i32, %c0_i32_0 : i32, i32, i32
  }
  func.func @transform_5(%arg0: i32) -> (i32, i32, i32) {
    %c0_i32 = arith.constant 0 : i32
    %c0_i32_0 = arith.constant 0 : i32
    %c0_i32_1 = arith.constant 0 : i32
    return %arg0, %c0_i32, %c0_i32_0 : i32, i32, i32
  }
}

module attributes {stable_mosaic.version = 11 : i64} {
  func.func @_k2_conv2(%arg0: i32, %arg1: memref<1x32x256xbf16, #tpu.memory_space<vmem>>, %arg2: memref<32x1xf32, #tpu.memory_space<vmem>>, %arg3: memref<1x32x1xf32, #tpu.memory_space<vmem>>, %arg4: memref<32x288xbf16, #tpu.memory_space<vmem>>, %arg5: memref<32x1xf32, #tpu.memory_space<vmem>>, %arg6: memref<1x32x256xbf16, #tpu.memory_space<vmem>>, %arg7: memref<1x32x1xf32, #tpu.memory_space<vmem>>, %arg8: memref<1x32x1xf32, #tpu.memory_space<vmem>>, %arg9: memref<288x256xbf16, #tpu.memory_space<vmem>>) attributes {dimension_semantics = [#tpu.dimension_semantics<parallel>], iteration_bounds = array<i64: 2>, scalar_prefetch = 0 : i64, scratch_operands = 1 : i64, tpu.core_type = #tpu.core_type<tc>, window_params = [{transform_indices = @transform_0, window_bounds = array<i64: 1, 32, 256>}, {pipeline_mode = #tpu.pipeline_mode<synchronous>, transform_indices = @transform_1, window_bounds = array<i64: 32, 1>}, {transform_indices = @transform_2, window_bounds = array<i64: 1, 32, 1>}, {pipeline_mode = #tpu.pipeline_mode<synchronous>, transform_indices = @transform_3, window_bounds = array<i64: 32, 288>}, {pipeline_mode = #tpu.pipeline_mode<synchronous>, transform_indices = @transform_4, window_bounds = array<i64: 32, 1>}, {transform_indices = @transform_5, window_bounds = array<i64: 1, 32, 256>}, {transform_indices = @transform_6, window_bounds = array<i64: 1, 32, 1>}, {transform_indices = @transform_7, window_bounds = array<i64: 1, 32, 1>}]} {
    %0 = tpu.iota {dimensions = array<i32: 1>} : vector<1x256xi32>
    %c16_i32 = arith.constant 16 : i32
    %c0_i32 = arith.constant 0 : i32
    %1 = arith.cmpi eq, %c16_i32, %c0_i32 : i32
    %c1_i32 = arith.constant 1 : i32
    %2 = arith.select %1, %c1_i32, %c16_i32 : i32
    %3 = vector.broadcast %2 : i32 to vector<1x256xi32>
    %4 = arith.remsi %0, %3 : vector<1x256xi32>
    %c0_i32_0 = arith.constant 0 : i32
    %5 = vector.broadcast %c0_i32_0 : i32 to vector<1x256xi32>
    %6 = arith.cmpi ne, %4, %5 : vector<1x256xi32>
    %c0_i32_1 = arith.constant 0 : i32
    %7 = vector.broadcast %c0_i32_1 : i32 to vector<1x256xi32>
    %8 = arith.cmpi slt, %4, %7 : vector<1x256xi32>
    %c0_i32_2 = arith.constant 0 : i32
    %9 = arith.cmpi slt, %2, %c0_i32_2 : i32
    %10 = vector.broadcast %9 : i1 to vector<1x256xi1>
    %11 = vector.broadcast %10 : vector<1x256xi1> to vector<1x256xi1>
    %12 = arith.xori %8, %11 : vector<1x256xi1>
    %13 = arith.andi %12, %6 : vector<1x256xi1>
    %14 = vector.broadcast %2 : i32 to vector<1x256xi32>
    %15 = arith.addi %4, %14 : vector<1x256xi32>
    %16 = arith.select %13, %15, %4 : vector<1x256xi1>, vector<1x256xi32>
    %c16_i32_3 = arith.constant 16 : i32
    %17 = vector.broadcast %c16_i32_3 : i32 to vector<1x256xi32>
    %18 = arith.cmpi sge, %0, %17 : vector<1x256xi32>
    %c240_i32 = arith.constant 240 : i32
    %19 = vector.broadcast %c240_i32 : i32 to vector<1x256xi32>
    %20 = arith.cmpi slt, %0, %19 : vector<1x256xi32>
    %c1_i32_4 = arith.constant 1 : i32
    %21 = vector.broadcast %c1_i32_4 : i32 to vector<1x256xi32>
    %22 = arith.cmpi sge, %16, %21 : vector<1x256xi32>
    %c14_i32 = arith.constant 14 : i32
    %23 = vector.broadcast %c14_i32 : i32 to vector<1x256xi32>
    %24 = arith.cmpi sle, %16, %23 : vector<1x256xi32>
    %25 = arith.andi %18, %22 : vector<1x256xi1>
    %26 = arith.andi %18, %24 : vector<1x256xi1>
    %27 = arith.andi %20, %22 : vector<1x256xi1>
    %28 = arith.andi %20, %24 : vector<1x256xi1>
    %c0 = arith.constant 0 : index
    %c0_5 = arith.constant 0 : index
    %29 = vector.load %arg2[%c0, %c0_5] : memref<32x1xf32, #tpu.memory_space<vmem>>, vector<32x1xf32>
    %c0_6 = arith.constant 0 : index
    %c0_7 = arith.constant 0 : index
    %c0_8 = arith.constant 0 : index
    %30 = vector.load %arg1[%c0_6, %c0_7, %c0_8] : memref<1x32x256xbf16, #tpu.memory_space<vmem>>, vector<1x32x256xbf16>
    %31 = vector.shape_cast %30 : vector<1x32x256xbf16> to vector<32x256xbf16>
    %32 = arith.extf %31 : vector<32x256xbf16> to vector<32x256xf32>
    %33 = vector.broadcast %29 : vector<32x1xf32> to vector<32x256xf32>
    %34 = arith.mulf %32, %33 : vector<32x256xf32>
    %c0_9 = arith.constant 0 : index
    %c0_10 = arith.constant 0 : index
    %c0_11 = arith.constant 0 : index
    %35 = vector.load %arg3[%c0_9, %c0_10, %c0_11] : memref<1x32x1xf32, #tpu.memory_space<vmem>>, vector<1x32x1xf32>
    %36 = vector.shape_cast %35 : vector<1x32x1xf32> to vector<32x1xf32>
    %37 = vector.broadcast %36 : vector<32x1xf32> to vector<32x256xf32>
    %38 = arith.addf %34, %37 : vector<32x256xf32>
    %cst = arith.constant 0.000000e+00 : f32
    %39 = vector.broadcast %cst : f32 to vector<32x256xf32>
    %40 = arith.subf %39, %38 : vector<32x256xf32>
    %41 = math.exp %40 : vector<32x256xf32>
    %cst_12 = arith.constant 1.000000e+00 : f32
    %42 = vector.broadcast %cst_12 : f32 to vector<32x256xf32>
    %43 = arith.addf %42, %41 : vector<32x256xf32>
    %cst_13 = arith.constant 1.000000e+00 : f32
    %44 = vector.broadcast %cst_13 : f32 to vector<32x256xf32>
    %45 = arith.divf %44, %43 : vector<32x256xf32>
    %46 = arith.mulf %38, %45 : vector<32x256xf32>
    %c17_i32 = arith.constant 17 : i32
    %47 = tpu.dynamic_rotate %46 by %c17_i32 dim 1 : vector<32x256xf32>, i32 -> vector<32x256xf32>
    %cst_14 = arith.constant 0.000000e+00 : f32
    %48 = vector.shape_cast %25 : vector<1x256xi1> to vector<1x256xi1>
    %49 = vector.broadcast %48 : vector<1x256xi1> to vector<32x256xi1>
    %50 = vector.broadcast %cst_14 : f32 to vector<32x256xf32>
    %51 = arith.select %49, %47, %50 : vector<32x256xi1>, vector<32x256xf32>
    %52 = arith.truncf %51 : vector<32x256xf32> to vector<32x256xbf16>
    %c0_15 = arith.constant 0 : index
    %c0_16 = arith.constant 0 : index
    %53 = vector.load %arg9[%c0_15, %c0_16] : memref<288x256xbf16, #tpu.memory_space<vmem>>, vector<32x256xbf16>
    tpu.vector_store %arg9[%c0_15, %c0_16], %52 {strides = array<i32>} : memref<288x256xbf16, #tpu.memory_space<vmem>>, vector<32x256xbf16>,
    %c16_i32_17 = arith.constant 16 : i32
    %54 = tpu.dynamic_rotate %46 by %c16_i32_17 dim 1 : vector<32x256xf32>, i32 -> vector<32x256xf32>
    %cst_18 = arith.constant 0.000000e+00 : f32
    %55 = vector.shape_cast %18 : vector<1x256xi1> to vector<1x256xi1>
    %56 = vector.broadcast %55 : vector<1x256xi1> to vector<32x256xi1>
    %57 = vector.broadcast %cst_18 : f32 to vector<32x256xf32>
    %58 = arith.select %56, %54, %57 : vector<32x256xi1>, vector<32x256xf32>
    %59 = arith.truncf %58 : vector<32x256xf32> to vector<32x256xbf16>
    %c32 = arith.constant 32 : index
    %c0_19 = arith.constant 0 : index
    %60 = vector.load %arg9[%c32, %c0_19] : memref<288x256xbf16, #tpu.memory_space<vmem>>, vector<32x256xbf16>
    tpu.vector_store %arg9[%c32, %c0_19], %59 {strides = array<i32>} : memref<288x256xbf16, #tpu.memory_space<vmem>>, vector<32x256xbf16>,
    %c15_i32 = arith.constant 15 : i32
    %61 = tpu.dynamic_rotate %46 by %c15_i32 dim 1 : vector<32x256xf32>, i32 -> vector<32x256xf32>
    %cst_20 = arith.constant 0.000000e+00 : f32
    %62 = vector.shape_cast %26 : vector<1x256xi1> to vector<1x256xi1>
    %63 = vector.broadcast %62 : vector<1x256xi1> to vector<32x256xi1>
    %64 = vector.broadcast %cst_20 : f32 to vector<32x256xf32>
    %65 = arith.select %63, %61, %64 : vector<32x256xi1>, vector<32x256xf32>
    %66 = arith.truncf %65 : vector<32x256xf32> to vector<32x256xbf16>
    %c64 = arith.constant 64 : index
    %c0_21 = arith.constant 0 : index
    %67 = vector.load %arg9[%c64, %c0_21] : memref<288x256xbf16, #tpu.memory_space<vmem>>, vector<32x256xbf16>
    tpu.vector_store %arg9[%c64, %c0_21], %66 {strides = array<i32>} : memref<288x256xbf16, #tpu.memory_space<vmem>>, vector<32x256xbf16>,
    %c1_i32_22 = arith.constant 1 : i32
    %68 = tpu.dynamic_rotate %46 by %c1_i32_22 dim 1 : vector<32x256xf32>, i32 -> vector<32x256xf32>
    %cst_23 = arith.constant 0.000000e+00 : f32
    %69 = vector.shape_cast %22 : vector<1x256xi1> to vector<1x256xi1>
    %70 = vector.broadcast %69 : vector<1x256xi1> to vector<32x256xi1>
    %71 = vector.broadcast %cst_23 : f32 to vector<32x256xf32>
    %72 = arith.select %70, %68, %71 : vector<32x256xi1>, vector<32x256xf32>
    %73 = arith.truncf %72 : vector<32x256xf32> to vector<32x256xbf16>
    %c96 = arith.constant 96 : index
    %c0_24 = arith.constant 0 : index
    %74 = vector.load %arg9[%c96, %c0_24] : memref<288x256xbf16, #tpu.memory_space<vmem>>, vector<32x256xbf16>
    tpu.vector_store %arg9[%c96, %c0_24], %73 {strides = array<i32>} : memref<288x256xbf16, #tpu.memory_space<vmem>>, vector<32x256xbf16>,
    %75 = arith.truncf %46 : vector<32x256xf32> to vector<32x256xbf16>
    %c128 = arith.constant 128 : index
    %c0_25 = arith.constant 0 : index
    %76 = vector.load %arg9[%c128, %c0_25] : memref<288x256xbf16, #tpu.memory_space<vmem>>, vector<32x256xbf16>
    tpu.vector_store %arg9[%c128, %c0_25], %75 {strides = array<i32>} : memref<288x256xbf16, #tpu.memory_space<vmem>>, vector<32x256xbf16>,
    %c255_i32 = arith.constant 255 : i32
    %77 = tpu.dynamic_rotate %46 by %c255_i32 dim 1 : vector<32x256xf32>, i32 -> vector<32x256xf32>
    %cst_26 = arith.constant 0.000000e+00 : f32
    %78 = vector.shape_cast %24 : vector<1x256xi1> to vector<1x256xi1>
    %79 = vector.broadcast %78 : vector<1x256xi1> to vector<32x256xi1>
    %80 = vector.broadcast %cst_26 : f32 to vector<32x256xf32>
    %81 = arith.select %79, %77, %80 : vector<32x256xi1>, vector<32x256xf32>
    %82 = arith.truncf %81 : vector<32x256xf32> to vector<32x256xbf16>
    %c160 = arith.constant 160 : index
    %c0_27 = arith.constant 0 : index
    %83 = vector.load %arg9[%c160, %c0_27] : memref<288x256xbf16, #tpu.memory_space<vmem>>, vector<32x256xbf16>
    tpu.vector_store %arg9[%c160, %c0_27], %82 {strides = array<i32>} : memref<288x256xbf16, #tpu.memory_space<vmem>>, vector<32x256xbf16>,
    %c241_i32 = arith.constant 241 : i32
    %84 = tpu.dynamic_rotate %46 by %c241_i32 dim 1 : vector<32x256xf32>, i32 -> vector<32x256xf32>
    %cst_28 = arith.constant 0.000000e+00 : f32
    %85 = vector.shape_cast %27 : vector<1x256xi1> to vector<1x256xi1>
    %86 = vector.broadcast %85 : vector<1x256xi1> to vector<32x256xi1>
    %87 = vector.broadcast %cst_28 : f32 to vector<32x256xf32>
    %88 = arith.select %86, %84, %87 : vector<32x256xi1>, vector<32x256xf32>
    %89 = arith.truncf %88 : vector<32x256xf32> to vector<32x256xbf16>
    %c192 = arith.constant 192 : index
    %c0_29 = arith.constant 0 : index
    %90 = vector.load %arg9[%c192, %c0_29] : memref<288x256xbf16, #tpu.memory_space<vmem>>, vector<32x256xbf16>
    tpu.vector_store %arg9[%c192, %c0_29], %89 {strides = array<i32>} : memref<288x256xbf16, #tpu.memory_space<vmem>>, vector<32x256xbf16>,
    %c240_i32_30 = arith.constant 240 : i32
    %91 = tpu.dynamic_rotate %46 by %c240_i32_30 dim 1 : vector<32x256xf32>, i32 -> vector<32x256xf32>
    %cst_31 = arith.constant 0.000000e+00 : f32
    %92 = vector.shape_cast %20 : vector<1x256xi1> to vector<1x256xi1>
    %93 = vector.broadcast %92 : vector<1x256xi1> to vector<32x256xi1>
    %94 = vector.broadcast %cst_31 : f32 to vector<32x256xf32>
    %95 = arith.select %93, %91, %94 : vector<32x256xi1>, vector<32x256xf32>
    %96 = arith.truncf %95 : vector<32x256xf32> to vector<32x256xbf16>
    %c224 = arith.constant 224 : index
    %c0_32 = arith.constant 0 : index
    %97 = vector.load %arg9[%c224, %c0_32] : memref<288x256xbf16, #tpu.memory_space<vmem>>, vector<32x256xbf16>
    tpu.vector_store %arg9[%c224, %c0_32], %96 {strides = array<i32>} : memref<288x256xbf16, #tpu.memory_space<vmem>>, vector<32x256xbf16>,
    %c239_i32 = arith.constant 239 : i32
    %98 = tpu.dynamic_rotate %46 by %c239_i32 dim 1 : vector<32x256xf32>, i32 -> vector<32x256xf32>
    %cst_33 = arith.constant 0.000000e+00 : f32
    %99 = vector.shape_cast %28 : vector<1x256xi1> to vector<1x256xi1>
    %100 = vector.broadcast %99 : vector<1x256xi1> to vector<32x256xi1>
    %101 = vector.broadcast %cst_33 : f32 to vector<32x256xf32>
    %102 = arith.select %100, %98, %101 : vector<32x256xi1>, vector<32x256xf32>
    %103 = arith.truncf %102 : vector<32x256xf32> to vector<32x256xbf16>
    %c256 = arith.constant 256 : index
    %c0_34 = arith.constant 0 : index
    %104 = vector.load %arg9[%c256, %c0_34] : memref<288x256xbf16, #tpu.memory_space<vmem>>, vector<32x256xbf16>
    tpu.vector_store %arg9[%c256, %c0_34], %103 {strides = array<i32>} : memref<288x256xbf16, #tpu.memory_space<vmem>>, vector<32x256xbf16>,
    %c0_35 = arith.constant 0 : index
    %c0_36 = arith.constant 0 : index
    %105 = vector.load %arg4[%c0_35, %c0_36] : memref<32x288xbf16, #tpu.memory_space<vmem>>, vector<32x288xbf16>
    %c0_37 = arith.constant 0 : index
    %c0_38 = arith.constant 0 : index
    %106 = vector.load %arg9[%c0_37, %c0_38] : memref<288x256xbf16, #tpu.memory_space<vmem>>, vector<288x256xbf16>
    %cst_39 = arith.constant dense<0.000000e+00> : vector<32x256xf32>
    %107 = tpu.matmul %105, %106, %cst_39 {dimension_numbers = #tpu.dot_dimension_numbers<[1], [0], [0], [1], [0, 0, 1, 1], [], []>} : vector<32x288xbf16>, vector<288x256xbf16>, vector<32x256xf32> -> vector<32x256xf32>
    %c0_40 = arith.constant 0 : index
    %c0_41 = arith.constant 0 : index
    %108 = vector.load %arg5[%c0_40, %c0_41] : memref<32x1xf32, #tpu.memory_space<vmem>>, vector<32x1xf32>
    %109 = vector.broadcast %108 : vector<32x1xf32> to vector<32x256xf32>
    %110 = arith.addf %107, %109 : vector<32x256xf32>
    %111 = arith.truncf %110 : vector<32x256xf32> to vector<32x256xbf16>
    %c0_42 = arith.constant 0 : index
    %c0_43 = arith.constant 0 : index
    %c0_44 = arith.constant 0 : index
    %112 = vector.load %arg6[%c0_42, %c0_43, %c0_44] : memref<1x32x256xbf16, #tpu.memory_space<vmem>>, vector<1x32x256xbf16>
    %113 = vector.shape_cast %112 : vector<1x32x256xbf16> to vector<32x256xbf16>
    %114 = vector.shape_cast %111 : vector<32x256xbf16> to vector<1x32x256xbf16>
    tpu.vector_store %arg6[%c0_42, %c0_43, %c0_44], %114 {strides = array<i32>} : memref<1x32x256xbf16, #tpu.memory_space<vmem>>, vector<1x32x256xbf16>,
    %cst_45 = arith.constant dense<0.000000e+00> : vector<32xf32>
    %115 = vector.multi_reduction <add>, %110, %cst_45 [1] : vector<32x256xf32> to vector<32xf32>
    %116 = vector.shape_cast %115 : vector<32xf32> to vector<32x1xf32>
    %c0_46 = arith.constant 0 : index
    %c0_47 = arith.constant 0 : index
    %c0_48 = arith.constant 0 : index
    %117 = vector.load %arg7[%c0_46, %c0_47, %c0_48] : memref<1x32x1xf32, #tpu.memory_space<vmem>>, vector<1x32x1xf32>
    %118 = vector.shape_cast %117 : vector<1x32x1xf32> to vector<32x1xf32>
    %119 = vector.shape_cast %116 : vector<32x1xf32> to vector<1x32x1xf32>
    tpu.vector_store %arg7[%c0_46, %c0_47, %c0_48], %119 {strides = array<i32>} : memref<1x32x1xf32, #tpu.memory_space<vmem>>, vector<1x32x1xf32>,
    %120 = arith.mulf %110, %110 : vector<32x256xf32>
    %cst_49 = arith.constant dense<0.000000e+00> : vector<32xf32>
    %121 = vector.multi_reduction <add>, %120, %cst_49 [1] : vector<32x256xf32> to vector<32xf32>
    %122 = vector.shape_cast %121 : vector<32xf32> to vector<32x1xf32>
    %c0_50 = arith.constant 0 : index
    %c0_51 = arith.constant 0 : index
    %c0_52 = arith.constant 0 : index
    %123 = vector.load %arg8[%c0_50, %c0_51, %c0_52] : memref<1x32x1xf32, #tpu.memory_space<vmem>>, vector<1x32x1xf32>
    %124 = vector.shape_cast %123 : vector<1x32x1xf32> to vector<32x1xf32>
    %125 = vector.shape_cast %122 : vector<32x1xf32> to vector<1x32x1xf32>
    tpu.vector_store %arg8[%c0_50, %c0_51, %c0_52], %125 {strides = array<i32>} : memref<1x32x1xf32, #tpu.memory_space<vmem>>, vector<1x32x1xf32>,
    return
  }
  func.func @transform_0(%arg0: i32) -> (i32, i32, i32) {
    %c0_i32 = arith.constant 0 : i32
    %c0_i32_0 = arith.constant 0 : i32
    %c0_i32_1 = arith.constant 0 : i32
    return %arg0, %c0_i32, %c0_i32_0 : i32, i32, i32
  }
  func.func @transform_1(%arg0: i32) -> (i32, i32) {
    %c0_i32 = arith.constant 0 : i32
    %c0_i32_0 = arith.constant 0 : i32
    %c0_i32_1 = arith.constant 0 : i32
    return %c0_i32, %c0_i32_0 : i32, i32
  }
  func.func @transform_2(%arg0: i32) -> (i32, i32, i32) {
    %c0_i32 = arith.constant 0 : i32
    %c0_i32_0 = arith.constant 0 : i32
    %c0_i32_1 = arith.constant 0 : i32
    return %arg0, %c0_i32, %c0_i32_0 : i32, i32, i32
  }
  func.func @transform_3(%arg0: i32) -> (i32, i32) {
    %c0_i32 = arith.constant 0 : i32
    %c0_i32_0 = arith.constant 0 : i32
    %c0_i32_1 = arith.constant 0 : i32
    return %c0_i32, %c0_i32_0 : i32, i32
  }
  func.func @transform_4(%arg0: i32) -> (i32, i32) {
    %c0_i32 = arith.constant 0 : i32
    %c0_i32_0 = arith.constant 0 : i32
    %c0_i32_1 = arith.constant 0 : i32
    return %c0_i32, %c0_i32_0 : i32, i32
  }
  func.func @transform_5(%arg0: i32) -> (i32, i32, i32) {
    %c0_i32 = arith.constant 0 : i32
    %c0_i32_0 = arith.constant 0 : i32
    %c0_i32_1 = arith.constant 0 : i32
    return %arg0, %c0_i32, %c0_i32_0 : i32, i32, i32
  }
  func.func @transform_6(%arg0: i32) -> (i32, i32, i32) {
    %c0_i32 = arith.constant 0 : i32
    %c0_i32_0 = arith.constant 0 : i32
    %c0_i32_1 = arith.constant 0 : i32
    return %arg0, %c0_i32, %c0_i32_0 : i32, i32, i32
  }
  func.func @transform_7(%arg0: i32) -> (i32, i32, i32) {
    %c0_i32 = arith.constant 0 : i32
    %c0_i32_0 = arith.constant 0 : i32
    %c0_i32_1 = arith.constant 0 : i32
    return %arg0, %c0_i32, %c0_i32_0 : i32, i32, i32
  }
}

module attributes {stable_mosaic.version = 11 : i64} {
  func.func @_k3_scale_silu(%arg0: i32, %arg1: memref<1x32x256xbf16, #tpu.memory_space<vmem>>, %arg2: memref<1x32x1xf32, #tpu.memory_space<vmem>>, %arg3: memref<1x32x1xf32, #tpu.memory_space<vmem>>, %arg4: memref<1x32x256xf32, #tpu.memory_space<vmem>>) attributes {dimension_semantics = [#tpu.dimension_semantics<parallel>], iteration_bounds = array<i64: 2>, scalar_prefetch = 0 : i64, scratch_operands = 0 : i64, tpu.core_type = #tpu.core_type<tc>, window_params = [{transform_indices = @transform_0, window_bounds = array<i64: 1, 32, 256>}, {transform_indices = @transform_1, window_bounds = array<i64: 1, 32, 1>}, {transform_indices = @transform_2, window_bounds = array<i64: 1, 32, 1>}, {transform_indices = @transform_3, window_bounds = array<i64: 1, 32, 256>}]} {
    %c0 = arith.constant 0 : index
    %c0_0 = arith.constant 0 : index
    %c0_1 = arith.constant 0 : index
    %0 = vector.load %arg1[%c0, %c0_0, %c0_1] : memref<1x32x256xbf16, #tpu.memory_space<vmem>>, vector<1x32x256xbf16>
    %1 = vector.shape_cast %0 : vector<1x32x256xbf16> to vector<32x256xbf16>
    %2 = arith.extf %1 : vector<32x256xbf16> to vector<32x256xf32>
    %c0_2 = arith.constant 0 : index
    %c0_3 = arith.constant 0 : index
    %c0_4 = arith.constant 0 : index
    %3 = vector.load %arg2[%c0_2, %c0_3, %c0_4] : memref<1x32x1xf32, #tpu.memory_space<vmem>>, vector<1x32x1xf32>
    %4 = vector.shape_cast %3 : vector<1x32x1xf32> to vector<32x1xf32>
    %5 = vector.broadcast %4 : vector<32x1xf32> to vector<32x256xf32>
    %6 = arith.mulf %2, %5 : vector<32x256xf32>
    %c0_5 = arith.constant 0 : index
    %c0_6 = arith.constant 0 : index
    %c0_7 = arith.constant 0 : index
    %7 = vector.load %arg3[%c0_5, %c0_6, %c0_7] : memref<1x32x1xf32, #tpu.memory_space<vmem>>, vector<1x32x1xf32>
    %8 = vector.shape_cast %7 : vector<1x32x1xf32> to vector<32x1xf32>
    %9 = vector.broadcast %8 : vector<32x1xf32> to vector<32x256xf32>
    %10 = arith.addf %6, %9 : vector<32x256xf32>
    %cst = arith.constant 0.000000e+00 : f32
    %11 = vector.broadcast %cst : f32 to vector<32x256xf32>
    %12 = arith.subf %11, %10 : vector<32x256xf32>
    %13 = math.exp %12 : vector<32x256xf32>
    %cst_8 = arith.constant 1.000000e+00 : f32
    %14 = vector.broadcast %cst_8 : f32 to vector<32x256xf32>
    %15 = arith.addf %14, %13 : vector<32x256xf32>
    %cst_9 = arith.constant 1.000000e+00 : f32
    %16 = vector.broadcast %cst_9 : f32 to vector<32x256xf32>
    %17 = arith.divf %16, %15 : vector<32x256xf32>
    %18 = arith.mulf %10, %17 : vector<32x256xf32>
    %c0_10 = arith.constant 0 : index
    %c0_11 = arith.constant 0 : index
    %c0_12 = arith.constant 0 : index
    %19 = vector.load %arg4[%c0_10, %c0_11, %c0_12] : memref<1x32x256xf32, #tpu.memory_space<vmem>>, vector<1x32x256xf32>
    %20 = vector.shape_cast %19 : vector<1x32x256xf32> to vector<32x256xf32>
    %21 = vector.shape_cast %18 : vector<32x256xf32> to vector<1x32x256xf32>
    tpu.vector_store %arg4[%c0_10, %c0_11, %c0_12], %21 {strides = array<i32>} : memref<1x32x256xf32, #tpu.memory_space<vmem>>, vector<1x32x256xf32>,
    return
  }
  func.func @transform_0(%arg0: i32) -> (i32, i32, i32) {
    %c0_i32 = arith.constant 0 : i32
    %c0_i32_0 = arith.constant 0 : i32
    %c0_i32_1 = arith.constant 0 : i32
    return %arg0, %c0_i32, %c0_i32_0 : i32, i32, i32
  }
  func.func @transform_1(%arg0: i32) -> (i32, i32, i32) {
    %c0_i32 = arith.constant 0 : i32
    %c0_i32_0 = arith.constant 0 : i32
    %c0_i32_1 = arith.constant 0 : i32
    return %arg0, %c0_i32, %c0_i32_0 : i32, i32, i32
  }
  func.func @transform_2(%arg0: i32) -> (i32, i32, i32) {
    %c0_i32 = arith.constant 0 : i32
    %c0_i32_0 = arith.constant 0 : i32
    %c0_i32_1 = arith.constant 0 : i32
    return %arg0, %c0_i32, %c0_i32_0 : i32, i32, i32
  }
  func.func @transform_3(%arg0: i32) -> (i32, i32, i32) {
    %c0_i32 = arith.constant 0 : i32
    %c0_i32_0 = arith.constant 0 : i32
    %c0_i32_1 = arith.constant 0 : i32
    return %arg0, %c0_i32, %c0_i32_0 : i32, i32, i32
  }
}

</mosaic_0001>

<bundles_post_ra>
// kernel: unet_block_pallas.3
= control target key start
LH: loop header
LB: loop body
LE: loop exit
PB: predicated region body
PF: predicated region fallthrough
CT: control target
= control target key end

     0   :  { %s1027_s18 = smov 0   ;;  %s1232_s0 = inlined_call_operand.vmem [shape: bf16[2,8,256], index: 0, kind: input, shape index: {}]   ;;  %s1233_s1 = inlined_call_operand.vmem [shape: bf16[32,72], index: 1, kind: input, shape index: {}]   ;;  %s1234_s2 = inlined_call_operand.vmem [shape: f32[32,1], index: 2, kind: input, shape index: {}]   ;;  %s1235_s3 = inlined_call_operand.vmem [shape: bf16[2,32,256], index: 3, kind: output, shape index: {0}]   ;;  %s1236_s4 = inlined_call_operand.vmem [shape: f32[2,32,1], index: 4, kind: output, shape index: {1}]   ;;  %s1237_s5 = inlined_call_operand.vmem [shape: f32[2,32,1], index: 5, kind: output, shape index: {2}]  }
   0x1 LB: > { %s823_s19 = sadd.s32 4294967295, %s985_s18   ;;  %p827_p0 = scmp.ge.s32.totalorder %s985_s18, 1  ;;  %s985_s18 = sphi %s1027_s18, %s16_s18  }
   0x2   : > { %p192_p1 = scmp.lt.s32.totalorder %s985_s18, 3 }
   0x4   : > { %p193_p2 = pnand %p827_p0, %p192_p1 }
   0x5   : > { %p230_p3 = scmp.lt.s32.totalorder (!%p193_p2), %s823_s19, 1  ;;  %s987_s24 = smov (!%p193_p2), 15   ;;  %v995_v4 = vmov (!%p193_p2), 0   ;;  %v488_v5 = vld [vmem:[%s1234_s2 + $0x8] sm:$0xff] (!%p193_p2)  ;;  %v487_v6 = vld [vmem:[%s1234_s2] sm:$0xff] (!%p193_p2)  ;;  %v489_v7 = vld [vmem:[%s1234_s2 + $0x10] sm:$0xff] (!%p193_p2)  ;;  %v251_v9 = vlaneseq (!%p193_p2) }
   0x6   : > { %196 = sbr.rel (%p193_p2) target bundleno = 538 (0x21a), region = 32  ;;  %s988_s25 = smov (!%p193_p2), 17   ;;  %612 = vmatprep.mubr.bf16.mxu0 (!%p193_p2), %v995_v4  ;;  %622 = vmatprep.mubr.bf16.mxu1 (!%p193_p2), %v995_v4  ;;  %v490_v8 = vld [vmem:[%s1234_s2 + $0x18] sm:$0xff] (!%p193_p2)  ;;  %vm996_vm10 = vmmov (!%p193_p2), 1  }
   0x7   : > { %s989_s26 = smov (!%p193_p2), 1   ;;  %s990_s27 = smov (!%p193_p2), 16   ;;  %976 = vset.pattern.permute.xlu1 (!%p193_p2), %v995_v4  ;;  %975 = vset.pattern.permute.xlu0 (!%p193_p2), %v995_v4  ;;  %v1057_v10 = vand.u32 (!%p193_p2), 127, %v251_v9 }
   0x8   : > { %s991_s28 = smov (!%p193_p2), 127   ;;  %s992_s29 = smov (!%p193_p2), 113  }
   0x9   : > { %s993_s30 = smov (!%p193_p2), 112   ;;  %s994_s6 = smov (!%p193_p2), 111   ;;  %v1060_v11 = vadd.s32 (!%p193_p2), 128, %v1057_v10  ;;  %v258_v12 = vand.u32 (!%p193_p2), 15, %v1057_v10  ;;  %vm278_vm1 = vcmp.ge.s32.totalorder (!%p193_p2), %v1057_v10, 16  ;;  %vm345_vm2 = vcmp.lt.s32.totalorder (!%p193_p2), %v1057_v10, 15 }
   0xa   : > { %vm301_vm4 = vcmp.lt.s32.totalorder (!%p193_p2), %v1057_v10, 17  ;;  %vm367_vm5 = vcmp.lt.s32.totalorder (!%p193_p2), %v1057_v10, 1  ;;  %vm390_vm6 = vcmp.lt.s32.totalorder (!%p193_p2), %v1057_v10, 127  ;;  %vm323_vm7 = vcmp.lt.s32.totalorder (!%p193_p2), %v1057_v10, 16 }
   0xb   : > { %v265_v13 = vand.u32 (!%p193_p2), 15, %v1060_v11  ;;  %vm1064_vm0 = vcmp.ge.s32.totalorder (!%p193_p2), %v258_v12, 1  ;;  %vm412_vm12 = vcmp.lt.s32.totalorder (!%p193_p2), %v1057_v10, 113  ;;  %vm1102_vm13 = vcmp.le.s32.totalorder (!%p193_p2), %v258_v12, 14 }
   0xc   : > { %vm1082_vm8 = vmand (!%p193_p2), %vm278_vm1, %vm1064_vm0 }
   0xd   : > { %s1255_s19 = smov (!%p230_p3, %s823_s19), 1  ;;  %vm1070_vm3 = vcmp.ge.s32.totalorder %v265_v13, 1  ;;  %vm1086_vm9 = vcmp.le.s32.totalorder %v265_v13, 14  ;;  %vm1118_vm14 = vmpackc.low %vm278_vm1, %vm1082_vm8 }
   0xe   : > { %s865_s20 = sshll.u32 %s1255_s19, 3  ;;  %vm1097_vm11 = vmpackc.low %vm996_vm10, %vm1070_vm3  ;;  %s1207_s21 = sshll.u32 %s1255_s19, 5 }
   0xf   : > { %s234_s23 = scalar_lea.vmem %s1232_s0, %s865_s20  ;;  %vm895_vm15 = vmpackc.low %vm1070_vm3, %vm1086_vm9 }
  0x10   : > { %v1041_v0 = vld [vmem:[%s234_s23] sm:$0xff] }
  0x11   : > { %v295_v1 = vunpack.c.l.bf16 %v1041_v0  ;;  %v296_v2 = vunpack.c.h.bf16 %v1041_v0 }
  0x13   : > { %v945_v3 = vpack.i.bf16 %v296_v2, %v295_v1 }
  0x15   : > { %946 = vrot.lane.b32.xlu1 %v945_v3, %s987_s24  ;;  %936 = vrot.lane.b32.xlu0 %v945_v3, %s988_s25  ;;  %s239_s24 = scalar_lea.vmem %s1235_s3, %s1207_s21 }
  0x19   : > { %951 = vrot.lane.b32.xlu1 %v945_v3, %s989_s26  ;;  %941 = vrot.lane.b32.xlu0 %v945_v3, %s990_s27  ;;  %s244_s26 = scalar_lea.vmem %s1236_s4, %s1207_s21 }
  0x1d   : > { %956 = vrot.lane.b32.xlu0 %v945_v3, %s991_s28  ;;  %961 = vrot.lane.b32.xlu1 %v945_v3, %s992_s29  ;;  %s249_s29 = scalar_lea.vmem %s1237_s5, %s1207_s21 }
  0x21   : > { %966 = vrot.lane.b32.xlu0 %v945_v3, %s993_s30  ;;  %971 = vrot.lane.b32.xlu1 %v945_v3, %s994_s6 }
  0x25   : > { %498 = vperm.xlu1 %976, %v488_v5   ;;  %493 = vperm.xlu0 %975, %v487_v6  }
  0x29   : > { %503 = vperm.xlu1 %976, %v489_v7   ;;  %508 = vperm.xlu0 %975, %v490_v8  }
  0x87   : > { %v947_v14 = vpop.permute.xlu1 %946  ;;  %v937_v15 = vpop.permute.xlu0 %936 }
  0x88   : > { %v949_v17 = vunpack.i.h.bf16 %v947_v14  ;;  %v948_v18 = vunpack.i.l.bf16 %v947_v14  ;;  %v939_v19 = vunpack.i.h.bf16 %v937_v15  ;;  %v938_v20 = vunpack.i.l.bf16 %v937_v15  ;;  %v977_v14 = vld [vmem:[%s1233_s1] sm:$0xff]   ;;  %v978_v15 = vld [vmem:[%s1233_s1 + $0x8] sm:$0xff]  }
  0x8a   : > { %v346_v30 = vsel %vm345_vm2, %v948_v18, %v949_v17  ;;  %v302_v31 = vsel %vm301_vm4, %v938_v20, %v939_v19  ;;  %v303_v36 = vsel %vm301_vm4, %v939_v19, %v938_v20  ;;  %v347_v39 = vsel %vm345_vm2, %v949_v17, %v948_v18  ;;  %vm1134_vm2 = vmand %vm278_vm1, %vm1102_vm13 }
  0x8b   : > { %v952_v22 = vpop.permute.xlu1 %951  ;;  %v942_v23 = vpop.permute.xlu0 %941  ;;  %vm281_vm4 = vcmp.lt.s32.totalorder %v1060_v11, 240  ;;  %vm434_vm1 = vcmp.lt.s32.totalorder %v1057_v10, 112 }
  0x8c   : > { %v954_v26 = vunpack.i.h.bf16 %v952_v22  ;;  %v953_v27 = vunpack.i.l.bf16 %v952_v22  ;;  %v944_v28 = vunpack.i.h.bf16 %v942_v23  ;;  %v943_v29 = vunpack.i.l.bf16 %v942_v23  ;;  %vm293_vm8 = vmand %vm281_vm4, %vm1086_vm9 }
  0x8e   : > { %v368_v34 = vsel %vm367_vm5, %v953_v27, %v954_v26  ;;  %v324_v35 = vsel %vm323_vm7, %v943_v29, %v944_v28  ;;  %v325_v37 = vsel %vm323_vm7, %v944_v28, %v943_v29  ;;  %v369_v40 = vsel %vm367_vm5, %v954_v26, %v953_v27  ;;  %vm291_vm7 = vmand %vm281_vm4, %vm1070_vm3 }
  0x8f   : > { %v957_v41 = vpop.permute.xlu0 %956  ;;  %v890_v42 = vpack.c.bf16 %v324_v35, %v302_v31  ;;  %v893_v43 = vpack.c.bf16 %v325_v37, %v303_v36  ;;  %v962_v44 = vpop.permute.xlu1 %961  ;;  %v896_v50 = vpack.c.bf16 %v368_v34, %v346_v30  ;;  %vm456_vm5 = vcmp.lt.s32.totalorder %v1057_v10, 111  ;;  %vm901_vm3 = vmpackc.low %vm281_vm4, %vm291_vm7 }
  0x90   : > { %v959_v45 = vunpack.i.h.bf16 %v957_v41  ;;  %v958_v46 = vunpack.i.l.bf16 %v957_v41  ;;  %v964_v47 = vunpack.i.h.bf16 %v962_v44  ;;  %v963_v48 = vunpack.i.l.bf16 %v962_v44 }
  0x91   : > { %891 = vmatprep.subr.msk.bf16.mxu0 %vm1097_vm11, %v890_v42  ;;  %907 = vmatprep.subr.msk.bf16.mxu1 %vm1097_vm11, %v890_v42  ;;  %v899_v53 = vpack.c.bf16 %v369_v40, %v347_v39  ;;  %vm573_vm11 = vcmask 1043456  }
  0x92   : > { %v391_v51 = vsel %vm390_vm6, %v958_v46, %v959_v45  ;;  %v392_v52 = vsel %vm390_vm6, %v959_v45, %v958_v46  ;;  %894 = vmatpush1.bf16.msk.msra.mxu0 %vm1118_vm14, %v893_v43  ;;  %912 = vmatpush1.bf16.msk.msra.mxu1 %vm1118_vm14, %v893_v43  ;;  %v414_v54 = vsel %vm412_vm12, %v964_v47, %v963_v48  ;;  %vm898_vm6 = vmpackc.low %vm1064_vm0, %vm1134_vm2 }
  0x93   : > { %897 = vmatprep.subr.msk.bf16.mxu0 %vm895_vm15, %v896_v50  ;;  %908 = vmatprep.subr.msk.bf16.mxu1 %vm895_vm15, %v896_v50  ;;  %v967_v55 = vpop.permute.xlu0 %966  ;;  %v397_v56 = vsel %vm1102_vm13, %v391_v51, 0.0  ;;  %v398_v57 = vsel %vm1086_vm9, %v392_v52, 0.0  ;;  %v972_v58 = vpop.permute.xlu1 %971  ;;  %v413_v8 = vsel %vm412_vm12, %v963_v48, %v964_v47  ;;  %vm904_vm9 = vmpackc.low %vm996_vm10, %vm1064_vm0  ;;  %vm566_vm0 = vcmask 588800  }
  0x94   : > { %v969_v59 = vunpack.i.h.bf16 %v967_v55  ;;  %v968_v60 = vunpack.i.l.bf16 %v967_v55  ;;  %v873_v61 = vpack.c.bf16 %v398_v57, %v397_v56  ;;  %v974_v62 = vunpack.i.h.bf16 %v972_v58 }
  0x95   : > { %v973_v63 = vunpack.i.l.bf16 %v972_v58  ;;  %vm673_vm10 = vcmask 7168  }
  0x96   : > { %v436_v1 = vsel %vm434_vm1, %v969_v59, %v968_v60  ;;  %900 = vmatpush1.bf16.msk.msra.mxu0 %vm898_vm6, %v899_v53  ;;  %913 = vmatpush1.bf16.msk.msra.mxu1 %vm898_vm6, %v899_v53  ;;  %v851_v2 = vcombine.high %v1041_v0, %v873_v61  ;;  %v850_v5 = vcombine.low %v1041_v0, %v873_v61 }
  0x97   : > { %v902_v3 = vpack.c.bf16 %v436_v1, %v414_v54  ;;  %v458_v4 = vsel %vm456_vm5, %v974_v62, %v973_v63  ;;  %v457_v7 = vsel %vm456_vm5, %v973_v63, %v974_v62  ;;  %v435_v9 = vsel %vm434_vm1, %v968_v60, %v969_v59 }
  0x98   : > { %584 = vmatprep.subr.bf16.mxu0 %v851_v2  ;;  %909 = vmatprep.subr.bf16.mxu1 %v851_v2  ;;  %v464_v6 = vsel %vm293_vm8, %v458_v4, 0.0  ;;  %v463_v12 = vsel %vm1102_vm13, %v457_v7, 0.0  ;;  %v905_v13 = vpack.c.bf16 %v435_v9, %v413_v8 }
  0x99   : > { %v888_v0 = vpack.c.bf16 %v464_v6, %v464_v6  ;;  %v887_v11 = vpack.c.bf16 %v463_v12, %v463_v12 }
  0x9a   : > { %585 = vmatpush1.bf16.msra.mxu0 %v850_v5  ;;  %914 = vmatpush1.bf16.msra.mxu1 %v850_v5 }
  0x9b   : > { %903 = vmatprep.subr.msk.bf16.mxu0 %vm901_vm3, %v902_v3  ;;  %910 = vmatprep.subr.msk.bf16.mxu1 %vm901_vm3, %v902_v3  ;;  %v575_v10 = vsel %vm573_vm11, %v887_v11, 0 }
  0x9e   : > { %906 = vmatpush1.bf16.msk.msra.mxu0 %vm904_vm9, %v905_v13  ;;  %915 = vmatpush1.bf16.msk.msra.mxu1 %vm904_vm9, %v905_v13 }
  0x9f   : > { %856 = vmatprep.subr.msk.bf16.mxu0 %vm573_vm11, %v888_v0  ;;  %911 = vmatprep.subr.msk.bf16.mxu1 %vm573_vm11, %v888_v0 }
  0xa2   : > { %589 = vmatpush1.bf16.msra.mxu0 %v575_v10  ;;  %916 = vmatpush1.bf16.msra.mxu1 %v575_v10 }
  0xa4   : > { %v499_v16 = vpop.permute.xlu1 %498  ;;  %v494_v17 = vpop.permute.xlu0 %493 }
  0xa5   : > { %857 = vmatmul.mubr.msk.bf16.vlgmr.msra.gmra.mrb[0].mxu0 %vm566_vm0, %v977_v14  ;;  %858 = vmatmul.mubr.msk.bf16.vlgmr.msra.gmra.mrb[0].mxu1 %vm566_vm0, %v978_v15 }
  0xa8   : > { %v504_v18 = vpop.permute.xlu1 %503  ;;  %v509_v19 = vpop.permute.xlu0 %508 }
 0x178   : > { %v614_v20 = vpop.f32.mrb[0].mxu0  ;;  %v624_v21 = vpop.f32.mrb[0].mxu1 }
 0x179   : > { %v615_v22 = vadd.f32 %v614_v20, %v494_v17  ;;  %v625_v23 = vadd.f32 %v624_v21, %v504_v18  ;;  %v616_v24 = vpop.f32.mrb[1].mxu0  ;;  %v626_v25 = vpop.f32.mrb[1].mxu1 }
 0x17a   : > { %v617_v26 = vadd.f32 %v616_v24, %v494_v17  ;;  %v627_v27 = vadd.f32 %v626_v25, %v504_v18  ;;  %v618_v28 = vpop.f32.mrb[2].mxu0  ;;  %v628_v29 = vpop.f32.mrb[2].mxu1 }
 0x17b   : > { %v619_v30 = vadd.f32 %v618_v28, %v499_v16  ;;  %v629_v31 = vadd.f32 %v628_v29, %v509_v19  ;;  %v620_v32 = vpop.f32.mrb[3].mxu0  ;;  %v630_v33 = vpop.f32.mrb[3].mxu1  ;;  %v678_v34 = vmul.f32 %v615_v22, %v615_v22  ;;  %v682_v35 = vmul.f32 %v625_v23, %v625_v23 }
 0x17c   : > { %v877_v36 = vpack.c.bf16 %v617_v26, %v615_v22  ;;  %v879_v37 = vpack.c.bf16 %v627_v27, %v625_v23  ;;  %v621_v38 = vadd.f32 %v620_v32, %v499_v16  ;;  %v631_v39 = vadd.f32 %v630_v33, %v509_v19 }
 0x17d   : > { %v667_v40 = vadd.f32 %v627_v27, %v625_v23  ;;  %v661_v41 = vadd.f32 %v617_v26, %v615_v22  ;;  %v679_v42 = vmul.f32 %v617_v26, %v617_v26  ;;  %v680_v43 = vmul.f32 %v619_v30, %v619_v30 }
 0x17e   : > { %657 = vst [vmem:[%s239_s24] sm:$0xff] %v877_v36  ;;  %659 = vst [vmem:[%s239_s24 + $0x10] sm:$0xff] %v879_v37  ;;  %v878_v44 = vpack.c.bf16 %v621_v38, %v619_v30  ;;  %v880_v45 = vpack.c.bf16 %v631_v39, %v629_v31  ;;  %v664_v46 = vadd.f32 %v621_v38, %v619_v30 }
 0x17f   : > { %v670_v47 = vadd.f32 %v631_v39, %v629_v31  ;;  %668 = vadd.xlane.f32.xlu0 %v667_v40  ;;  %662 = vadd.xlane.f32.xlu1 %v661_v41  ;;  %v686_v48 = vadd.f32 %v679_v42, %v678_v34  ;;  %v681_v49 = vmul.f32 %v621_v38, %v621_v38 }
 0x180   : > { %v683_v50 = vmul.f32 %v627_v27, %v627_v27  ;;  %658 = vst [vmem:[%s239_s24 + $0x8] sm:$0xff] %v878_v44  ;;  %660 = vst [vmem:[%s239_s24 + $0x18] sm:$0xff] %v880_v45  ;;  %v684_v51 = vmul.f32 %v629_v31, %v629_v31  ;;  %v685_v52 = vmul.f32 %v631_v39, %v631_v39 }
 0x181   : > { %v689_v53 = vadd.f32 %v681_v49, %v680_v43 }
 0x182   : > { %v692_v54 = vadd.f32 %v683_v50, %v682_v35  ;;  %v695_v55 = vadd.f32 %v685_v52, %v684_v51 }
 0x183   : > { %665 = vadd.xlane.f32.xlu0 %v664_v46  ;;  %671 = vadd.xlane.f32.xlu1 %v670_v47 }
 0x187   : > { %687 = vadd.xlane.f32.xlu0 %v686_v48  ;;  %690 = vadd.xlane.f32.xlu1 %v689_v53 }
 0x18b   : > { %693 = vadd.xlane.f32.xlu0 %v692_v54  ;;  %696 = vadd.xlane.f32.xlu1 %v695_v55 }
 0x20c   : > { %v669_v56 = vpop.xlane.xlu0 %668  ;;  %v663_v57 = vpop.xlane.xlu1 %662 }
 0x20d   : > { %676 = vst.msk [vmem:[%s244_s26 + $0x10] sm:$0xff] %vm673_vm10, %v669_v56  ;;  %674 = vst.msk [vmem:[%s244_s26] sm:$0xff] %vm673_vm10, %v663_v57 }
 0x210   : > { %v666_v58 = vpop.xlane.xlu0 %665  ;;  %v672_v59 = vpop.xlane.xlu1 %671 }
 0x211   : > { %675 = vst.msk [vmem:[%s244_s26 + $0x8] sm:$0xff] %vm673_vm10, %v666_v58  ;;  %677 = vst.msk [vmem:[%s244_s26 + $0x18] sm:$0xff] %vm673_vm10, %v672_v59 }
 0x214   : > { %v688_v60 = vpop.xlane.xlu0 %687  ;;  %v691_v61 = vpop.xlane.xlu1 %690 }
 0x215   : > { %698 = vst.msk [vmem:[%s249_s29] sm:$0xff] %vm673_vm10, %v688_v60  ;;  %699 = vst.msk [vmem:[%s249_s29 + $0x8] sm:$0xff] %vm673_vm10, %v691_v61 }
 0x218   : > { %v694_v62 = vpop.xlane.xlu0 %693  ;;  %v697_v63 = vpop.xlane.xlu1 %696 }
 0x219   : > { %700 = vst.msk [vmem:[%s249_s29 + $0x10] sm:$0xff] %vm673_vm10, %v694_v62  ;;  %701 = vst.msk [vmem:[%s249_s29 + $0x18] sm:$0xff] %vm673_vm10, %v697_v63 }
 0x21a PF: > { %s16_s18 = sadd.s32 1, %s985_s18  }
 0x21b   : > { %p13_p4 = scmp.ge.s32.totalorder %s16_s18, 4  }
 0x21d   :  { %15 = sbr.rel (!%p13_p4) target bundleno = 1 (0x1), region = 86 }

// kernel: unet_block_pallas.5
= control target key start
LH: loop header
LB: loop body
LE: loop exit
PB: predicated region body
PF: predicated region fallthrough
CT: control target
= control target key end

     0   :  { %s521_s12 = smov 0   ;;  %s572_s0 = inlined_call_operand.vmem [shape: bf16[2,32,256], index: 0, kind: input, shape index: {}]   ;;  %s573_s1 = inlined_call_operand.vmem [shape: f32[2,32,1], index: 1, kind: input, shape index: {}]   ;;  %s574_s2 = inlined_call_operand.vmem [shape: f32[2,32,1], index: 2, kind: input, shape index: {}]   ;;  %s575_s3 = inlined_call_operand.vmem [shape: f32[2,32,256], index: 3, kind: output, shape index: {}]  }
   0x1 LB: > { %s430_s13 = sadd.s32 4294967295, %s498_s12   ;;  %p434_p0 = scmp.ge.s32.totalorder %s498_s12, 1  ;;  %s498_s12 = sphi %s521_s12, %s13_s12  }
   0x2   : > { %p157_p1 = scmp.lt.s32.totalorder %s498_s12, 3 }
   0x4   : > { %p158_p2 = pnand %p434_p0, %p157_p1 }
   0x5   : > { %p191_p3 = scmp.lt.s32.totalorder (!%p158_p2), %s430_s13, 1  ;;  %v500_v0 = vmov (!%p158_p2), 0  }
   0x6   : > { %161 = sbr.rel (%p158_p2) target bundleno = 193 (0xc1), region = 32  ;;  %459 = vset.pattern.permute.xlu1 (!%p158_p2), %v500_v0  ;;  %458 = vset.pattern.permute.xlu0 (!%p158_p2), %v500_v0 }
   0xd   : > { %s577_s13 = smov (!%p191_p3, %s430_s13), 1 }
   0xe   : > { %s445_s14 = sshll.u32 %s577_s13, 5  ;;  %s448_s24 = sshll.u32 %s577_s13, 6 }
   0xf   : > { %s200_s17 = scalar_lea.vmem %s573_s1, %s445_s14  ;;  %s205_s20 = scalar_lea.vmem %s574_s2, %s445_s14 }
  0x10   : > { %v225_v1 = vld [vmem:[%s200_s17 + $0x10] sm:$0xff]  ;;  %v223_v2 = vld [vmem:[%s200_s17] sm:$0xff]  ;;  %v226_v3 = vld [vmem:[%s200_s17 + $0x18] sm:$0xff]  ;;  %s195_s23 = scalar_lea.vmem %s572_s0, %s445_s14  ;;  %s210_s27 = scalar_lea.vmem %s575_s3, %s448_s24 }
  0x11   : > { %239 = vperm.xlu1 %459, %v225_v1   ;;  %229 = vperm.xlu0 %458, %v223_v2   ;;  %v224_v4 = vld [vmem:[%s200_s17 + $0x8] sm:$0xff]  ;;  %v255_v6 = vld [vmem:[%s205_s20] sm:$0xff]  ;;  %v258_v7 = vld [vmem:[%s205_s20 + $0x18] sm:$0xff] }
  0x12   : > { %v256_v5 = vld [vmem:[%s205_s20 + $0x8] sm:$0xff]  ;;  %v257_v8 = vld [vmem:[%s205_s20 + $0x10] sm:$0xff]  ;;  %v211_v11 = vld [vmem:[%s195_s23] sm:$0xff] }
  0x13   : > { %v212_v12 = vld [vmem:[%s195_s23 + $0x8] sm:$0xff]  ;;  %v215_v13 = vunpack.c.l.bf16 %v211_v11  ;;  %v216_v14 = vunpack.c.h.bf16 %v211_v11  ;;  %v214_v15 = vld [vmem:[%s195_s23 + $0x18] sm:$0xff]  ;;  %v213_v20 = vld [vmem:[%s195_s23 + $0x10] sm:$0xff] }
  0x14   : > { %v217_v16 = vunpack.c.l.bf16 %v212_v12  ;;  %v218_v17 = vunpack.c.h.bf16 %v212_v12  ;;  %v221_v21 = vunpack.c.l.bf16 %v214_v15  ;;  %v219_v26 = vunpack.c.l.bf16 %v213_v20 }
  0x15   : > { %244 = vperm.xlu1 %459, %v226_v3   ;;  %234 = vperm.xlu0 %458, %v224_v4   ;;  %v220_v27 = vunpack.c.h.bf16 %v213_v20  ;;  %v222_v28 = vunpack.c.h.bf16 %v214_v15 }
  0x19   : > { %266 = vperm.xlu1 %459, %v256_v5   ;;  %261 = vperm.xlu0 %458, %v255_v6  }
  0x1d   : > { %276 = vperm.xlu1 %459, %v258_v7   ;;  %271 = vperm.xlu0 %458, %v257_v8  }
  0x90   : > { %v240_v9 = vpop.permute.xlu1 %239  ;;  %v230_v10 = vpop.permute.xlu0 %229 }
  0x91   : > { %v247_v22 = vmul.f32 %v230_v10, %v215_v13  ;;  %v248_v23 = vmul.f32 %v230_v10, %v216_v14  ;;  %v251_v40 = vmul.f32 %v240_v9, %v219_v26  ;;  %v252_v41 = vmul.f32 %v240_v9, %v220_v27 }
  0x94   : > { %v245_v18 = vpop.permute.xlu1 %244  ;;  %v235_v19 = vpop.permute.xlu0 %234 }
  0x95   : > { %v249_v24 = vmul.f32 %v235_v19, %v217_v16  ;;  %v250_v25 = vmul.f32 %v235_v19, %v218_v17  ;;  %v253_v35 = vmul.f32 %v245_v18, %v221_v21  ;;  %v254_v42 = vmul.f32 %v245_v18, %v222_v28 }
  0x98   : > { %v267_v29 = vpop.permute.xlu1 %266  ;;  %v262_v30 = vpop.permute.xlu0 %261 }
  0x99   : > { %v541_v31 = vadd.f32 %v267_v29, %v249_v24  ;;  %v543_v32 = vadd.f32 %v267_v29, %v250_v25  ;;  %v545_v33 = vadd.f32 %v262_v30, %v247_v22  ;;  %v547_v34 = vadd.f32 %v262_v30, %v248_v23 }
  0x9b   : > { %v289_v36 = vsub.f32 0.0, %v541_v31  ;;  %v290_v37 = vsub.f32 0.0, %v543_v32  ;;  %v287_v38 = vsub.f32 0.0, %v545_v33  ;;  %v288_v39 = vsub.f32 0.0, %v547_v34 }
  0x9c   : > { %v277_v43 = vpop.permute.xlu1 %276  ;;  %v272_v44 = vpop.permute.xlu0 %271 }
  0x9d   : > { %v299_v45 = vmul.f32 1.442695, %v289_v36  ;;  %v301_v46 = vmul.f32 1.442695, %v290_v37  ;;  %v295_v47 = vmul.f32 1.442695, %v287_v38  ;;  %v285_v48 = vadd.f32 %v277_v43, %v253_v35 }
  0x9e   : > { %v297_v49 = vmul.f32 1.442695, %v288_v39  ;;  %v286_v50 = vadd.f32 %v277_v43, %v254_v42  ;;  %v553_v51 = vadd.f32 %v272_v44, %v251_v40  ;;  %v555_v52 = vadd.f32 %v272_v44, %v252_v41 }
  0x9f   : > { %460 = vpow2.f32 %v299_v45  ;;  %v293_v53 = vsub.f32 0.0, %v285_v48 }
  0xa0   : > { %462 = vpow2.f32 %v301_v46  ;;  %v294_v54 = vsub.f32 0.0, %v286_v50  ;;  %v291_v55 = vsub.f32 0.0, %v553_v51  ;;  %v292_v56 = vsub.f32 0.0, %v555_v52 }
  0xa1   : > { %464 = vpow2.f32 %v295_v47  ;;  %v307_v57 = vmul.f32 1.442695, %v293_v53 }
  0xa2   : > { %466 = vpow2.f32 %v297_v49  ;;  %v309_v58 = vmul.f32 1.442695, %v294_v54  ;;  %v303_v59 = vmul.f32 1.442695, %v291_v55  ;;  %v305_v60 = vmul.f32 1.442695, %v292_v56 }
  0xa3   : > { %468 = vpow2.f32 %v307_v57 }
  0xa4   : > { %470 = vpow2.f32 %v309_v58 }
  0xa5   : > { %472 = vpow2.f32 %v303_v59 }
  0xa6   : > { %474 = vpow2.f32 %v305_v60 }
  0xa9   : > { %v461_v61 = vpop.eup %460 }
  0xaa   : > { %v463_v62 = vpop.eup %462  ;;  %v313_v63 = vadd.f32 1.0, %v461_v61 }
  0xab   : > { %v465_v0 = vpop.eup %464  ;;  %v314_v1 = vadd.f32 1.0, %v463_v62 }
  0xac   : > { %v467_v2 = vpop.eup %466  ;;  %476 = vrcp.f32 %v313_v63  ;;  %v311_v3 = vadd.f32 1.0, %v465_v0 }
  0xad   : > { %v469_v4 = vpop.eup %468  ;;  %478 = vrcp.f32 %v314_v1  ;;  %v312_v5 = vadd.f32 1.0, %v467_v2 }
  0xae   : > { %v471_v6 = vpop.eup %470  ;;  %480 = vrcp.f32 %v311_v3  ;;  %v317_v7 = vadd.f32 1.0, %v469_v4 }
  0xaf   : > { %v473_v8 = vpop.eup %472  ;;  %482 = vrcp.f32 %v312_v5  ;;  %v318_v9 = vadd.f32 1.0, %v471_v6 }
  0xb0   : > { %v475_v10 = vpop.eup %474  ;;  %484 = vrcp.f32 %v317_v7  ;;  %v315_v11 = vadd.f32 1.0, %v473_v8 }
  0xb1   : > { %486 = vrcp.f32 %v318_v9  ;;  %v316_v12 = vadd.f32 1.0, %v475_v10 }
  0xb2   : > { %488 = vrcp.f32 %v315_v11 }
  0xb3   : > { %490 = vrcp.f32 %v316_v12 }
  0xb6   : > { %v477_v13 = vpop.eup %476 }
  0xb7   : > { %v479_v14 = vpop.eup %478  ;;  %v337_v15 = vmul.f32 %v477_v13, %v541_v31 }
  0xb8   : > { %v481_v16 = vpop.eup %480  ;;  %v338_v17 = vmul.f32 %v479_v14, %v543_v32 }
  0xb9   : > { %v483_v18 = vpop.eup %482  ;;  %345 = vst [vmem:[%s210_s27 + $0x10] sm:$0xff] %v337_v15  ;;  %v335_v19 = vmul.f32 %v481_v16, %v545_v33 }
  0xba   : > { %v485_v20 = vpop.eup %484  ;;  %346 = vst [vmem:[%s210_s27 + $0x18] sm:$0xff] %v338_v17  ;;  %v336_v21 = vmul.f32 %v483_v18, %v547_v34 }
  0xbb   : > { %v487_v22 = vpop.eup %486  ;;  %343 = vst [vmem:[%s210_s27] sm:$0xff] %v335_v19  ;;  %v341_v23 = vmul.f32 %v485_v20, %v285_v48 }
  0xbc   : > { %v489_v24 = vpop.eup %488  ;;  %344 = vst [vmem:[%s210_s27 + $0x8] sm:$0xff] %v336_v21  ;;  %v342_v25 = vmul.f32 %v487_v22, %v286_v50 }
  0xbd   : > { %v491_v26 = vpop.eup %490  ;;  %349 = vst [vmem:[%s210_s27 + $0x30] sm:$0xff] %v341_v23  ;;  %v339_v27 = vmul.f32 %v489_v24, %v553_v51 }
  0xbe   : > { %350 = vst [vmem:[%s210_s27 + $0x38] sm:$0xff] %v342_v25  ;;  %v340_v28 = vmul.f32 %v491_v26, %v555_v52 }
  0xbf   : > { %347 = vst [vmem:[%s210_s27 + $0x20] sm:$0xff] %v339_v27 }
  0xc0   : > { %348 = vst [vmem:[%s210_s27 + $0x28] sm:$0xff] %v340_v28 }
  0xc1 PF: > { %s13_s12 = sadd.s32 1, %s498_s12  }
  0xc2   : > { %p10_p4 = scmp.ge.s32.totalorder %s13_s12, 4  }
  0xc4   :  { %12 = sbr.rel (!%p10_p4) target bundleno = 1 (0x1), region = 68 }

// kernel: unet_block_pallas.4
= control target key start
LH: loop header
LB: loop body
LE: loop exit
PB: predicated region body
PF: predicated region fallthrough
CT: control target
= control target key end

     0   :  { %s1695_s24 = smov 0   ;;  %s2187_s0 = inlined_call_operand.vmem [shape: bf16[2,32,256], index: 0, kind: input, shape index: {}]   ;;  %s2188_s1 = inlined_call_operand.vmem [shape: f32[32,1], index: 1, kind: input, shape index: {}]   ;;  %s2189_s2 = inlined_call_operand.vmem [shape: f32[2,32,1], index: 2, kind: input, shape index: {}]   ;;  %s2190_s3 = inlined_call_operand.vmem [shape: bf16[32,288], index: 3, kind: input, shape index: {}]   ;;  %s2191_s4 = inlined_call_operand.vmem [shape: f32[32,1], index: 4, kind: input, shape index: {}]   ;;  %s2192_s5 = inlined_call_operand.vmem [shape: bf16[2,32,256], index: 5, kind: output, shape index: {0}]   ;;  %s2193_s6 = inlined_call_operand.vmem [shape: f32[2,32,1], index: 6, kind: output, shape index: {1}]   ;;  %s2194_s7 = inlined_call_operand.vmem [shape: f32[2,32,1], index: 7, kind: output, shape index: {2}]  }
   0x1 LB: > { %s1281_s25 = sadd.s32 4294967295, %s1644_s24   ;;  %p1285_p0 = scmp.ge.s32.totalorder %s1644_s24, 1  ;;  %s1644_s24 = sphi %s1695_s24, %s18_s24  }
   0x2   : > { %p252_p1 = scmp.lt.s32.totalorder %s1644_s24, 3 }
   0x4   : > { %p253_p2 = pnand %p1285_p0, %p252_p1 }
   0x5   : > { %v368_v0 = vld [vmem:[%s2188_s1] sm:$0xff] (!%p253_p2)  ;;  %p299_p3 = scmp.lt.s32.totalorder (!%p253_p2), %s1281_s25, 1  ;;  %v1646_v1 = vmov (!%p253_p2), 0   ;;  %v369_v2 = vld [vmem:[%s2188_s1 + $0x8] sm:$0xff] (!%p253_p2)  ;;  %v370_v4 = vld [vmem:[%s2188_s1 + $0x10] sm:$0xff] (!%p253_p2)  ;;  %s1647_s18 = smov (!%p253_p2), 17  }
   0x6   : > { %256 = sbr.rel (%p253_p2) target bundleno = 752 (0x2f0), region = 40  ;;  %1436 = vset.pattern.permute.xlu0 (!%p253_p2), %v1646_v1  ;;  %1437 = vset.pattern.permute.xlu1 (!%p253_p2), %v1646_v1  ;;  %v371_v7 = vld [vmem:[%s2188_s1 + $0x18] sm:$0xff] (!%p253_p2)  ;;  %s1648_s19 = smov (!%p253_p2), 16  }
   0x7   : > { %386 = vperm.xlu0 (!%p253_p2), %1436, %v368_v0   ;;  %1058 = vmatprep.mubr.bf16.mxu0 (!%p253_p2), %v1646_v1  ;;  %s1649_s20 = smov (!%p253_p2), 15   ;;  %s1650_s21 = smov (!%p253_p2), 1  }
   0x8   : > { %s1651_s22 = smov (!%p253_p2), 127   ;;  %s1652_s23 = smov (!%p253_p2), 113  }
   0x9   : > { %s1654_s26 = smov (!%p253_p2), 111  }
   0xb   : > { %391 = vperm.xlu0 (!%p253_p2), %1436, %v369_v2  }
   0xd   : > { %s2224_s25 = smov (!%p299_p3, %s1281_s25), 1 }
   0xe   : > { %s1712_s30 = sshll.u32 %s2224_s25, 5  ;;  %s1653_s25 = smov 112  }
   0xf   : > { %s308_s10 = scalar_lea.vmem %s2189_s2, %s1712_s30  ;;  %396 = vperm.xlu0 %1436, %v370_v4   ;;  %s303_s17 = scalar_lea.vmem %s2187_s0, %s1712_s30 }
  0x10   : > { %v412_v3 = vld [vmem:[%s308_s10] sm:$0xff]  ;;  %v413_v5 = vld [vmem:[%s308_s10 + $0x8] sm:$0xff]  ;;  %v414_v6 = vld [vmem:[%s308_s10 + $0x10] sm:$0xff]  ;;  %s2162_s28 = scalar_lea.vmem %s2192_s5, %s1712_s30  ;;  %s318_s9 = scalar_lea.vmem %s2193_s6, %s1712_s30 }
  0x11   : > { %418 = vperm.xlu1 %1437, %v412_v3   ;;  %v415_v8 = vld [vmem:[%s308_s10 + $0x18] sm:$0xff]  ;;  %v372_v9 = vld [vmem:[%s303_s17] sm:$0xff]  ;;  %v373_v13 = vld [vmem:[%s303_s17 + $0x8] sm:$0xff]  ;;  %s323_s12 = scalar_lea.vmem %s2194_s7, %s1712_s30 }
  0x12   : > { %v376_v10 = vunpack.c.l.bf16 %v372_v9  ;;  %v377_v11 = vunpack.c.h.bf16 %v372_v9  ;;  %v378_v17 = vunpack.c.l.bf16 %v373_v13  ;;  %v379_v18 = vunpack.c.h.bf16 %v373_v13  ;;  %v374_v19 = vld [vmem:[%s303_s17 + $0x10] sm:$0xff]  ;;  %v375_v30 = vld [vmem:[%s303_s17 + $0x18] sm:$0xff] }
  0x13   : > { %428 = vperm.xlu0 %1436, %v414_v6   ;;  %v380_v23 = vunpack.c.l.bf16 %v374_v19  ;;  %v381_v24 = vunpack.c.h.bf16 %v374_v19  ;;  %v382_v38 = vunpack.c.l.bf16 %v375_v30  ;;  %v383_v42 = vunpack.c.h.bf16 %v375_v30 }
  0x15   : > { %423 = vperm.xlu1 %1437, %v413_v5  }
  0x19   : > { %401 = vperm.xlu1 %1437, %v371_v7  }
  0x1d   : > { %433 = vperm.xlu1 %1437, %v415_v8  }
  0x86   : > { %v387_v12 = vpop.permute.xlu0 %386 }
  0x87   : > { %v404_v14 = vmul.f32 %v387_v12, %v376_v10  ;;  %v405_v15 = vmul.f32 %v387_v12, %v377_v11 }
  0x8a   : > { %v392_v16 = vpop.permute.xlu0 %391 }
  0x8b   : > { %v406_v25 = vmul.f32 %v392_v16, %v378_v17  ;;  %v407_v26 = vmul.f32 %v392_v16, %v379_v18 }
  0x8e   : > { %v397_v29 = vpop.permute.xlu0 %396 }
  0x8f   : > { %v408_v36 = vmul.f32 %v397_v29, %v380_v23  ;;  %v409_v37 = vmul.f32 %v397_v29, %v381_v24 }
  0x90   : > { %v419_v20 = vpop.permute.xlu1 %418 }
  0x91   : > { %v1728_v21 = vadd.f32 %v419_v20, %v404_v14  ;;  %v1730_v22 = vadd.f32 %v419_v20, %v405_v15 }
  0x92   : > { %v429_v41 = vpop.permute.xlu0 %428 }
  0x93   : > { %v444_v27 = vsub.f32 0.0, %v1728_v21  ;;  %v445_v28 = vsub.f32 0.0, %v1730_v22  ;;  %v1740_v43 = vadd.f32 %v429_v41, %v408_v36  ;;  %v1742_v44 = vadd.f32 %v429_v41, %v409_v37  ;;  %v914_v41 = vld [vmem:[%s2191_s4 + $0x10] sm:$0xff] }
  0x94   : > { %v424_v31 = vpop.permute.xlu1 %423 }
  0x95   : > { %v452_v32 = vmul.f32 1.442695, %v444_v27  ;;  %v454_v33 = vmul.f32 1.442695, %v445_v28  ;;  %v1734_v34 = vadd.f32 %v424_v31, %v406_v25  ;;  %v1736_v35 = vadd.f32 %v424_v31, %v407_v26 }
  0x96   : > { %v448_v48 = vsub.f32 0.0, %v1740_v43  ;;  %v449_v49 = vsub.f32 0.0, %v1742_v44 }
  0x97   : > { %1606 = vpow2.f32 %v452_v32  ;;  %v446_v39 = vsub.f32 0.0, %v1734_v34  ;;  %v447_v40 = vsub.f32 0.0, %v1736_v35 }
  0x98   : > { %1608 = vpow2.f32 %v454_v33  ;;  %v402_v45 = vpop.permute.xlu1 %401  ;;  %v460_v52 = vmul.f32 1.442695, %v448_v48  ;;  %v462_v53 = vmul.f32 1.442695, %v449_v49 }
  0x99   : > { %v456_v46 = vmul.f32 1.442695, %v446_v39  ;;  %v458_v47 = vmul.f32 1.442695, %v447_v40  ;;  %v410_v50 = vmul.f32 %v402_v45, %v382_v38  ;;  %v411_v51 = vmul.f32 %v402_v45, %v383_v42  ;;  %v1600_v38 = vld [vmem:[%s2190_s3 + $0x4] ss:$12 sps:$4 sm:$0xff]  }
  0x9a   : > { %1005 = vmatprep.mubr.bf16.mxu1 %v1600_v38  ;;  %v912_v39 = vld [vmem:[%s2191_s4] sm:$0xff]  ;;  %v913_v40 = vld [vmem:[%s2191_s4 + $0x8] sm:$0xff]  ;;  %v915_v42 = vld [vmem:[%s2191_s4 + $0x18] sm:$0xff] }
  0x9b   : > { %1610 = vpow2.f32 %v456_v46 }
  0x9c   : > { %1612 = vpow2.f32 %v458_v47  ;;  %v434_v54 = vpop.permute.xlu1 %433 }
  0x9d   : > { %v442_v55 = vadd.f32 %v434_v54, %v410_v50  ;;  %v443_v56 = vadd.f32 %v434_v54, %v411_v51  ;;  %1614 = vpow2.f32 %v460_v52 }
  0x9e   : > { %1616 = vpow2.f32 %v462_v53 }
  0x9f   : > { %v450_v57 = vsub.f32 0.0, %v442_v55  ;;  %v451_v58 = vsub.f32 0.0, %v443_v56 }
  0xa1   : > { %v1607_v59 = vpop.eup %1606  ;;  %v464_v60 = vmul.f32 1.442695, %v450_v57  ;;  %v466_v63 = vmul.f32 1.442695, %v451_v58 }
  0xa2   : > { %v1609_v61 = vpop.eup %1608  ;;  %v468_v62 = vadd.f32 1.0, %v1607_v59 }
  0xa3   : > { %v469_v0 = vadd.f32 1.0, %v1609_v61  ;;  %1618 = vpow2.f32 %v464_v60 }
  0xa4   : > { %1620 = vrcp.f32 %v468_v62 }
  0xa5   : > { %v1611_v2 = vpop.eup %1610  ;;  %1622 = vpow2.f32 %v466_v63 }
  0xa6   : > { %v1613_v3 = vpop.eup %1612  ;;  %v470_v4 = vadd.f32 1.0, %v1611_v2  ;;  %1624 = vrcp.f32 %v469_v0 }
  0xa7   : > { %v471_v5 = vadd.f32 1.0, %v1613_v3  ;;  %v1615_v6 = vpop.eup %1614 }
  0xa8   : > { %1626 = vrcp.f32 %v470_v4  ;;  %v1617_v7 = vpop.eup %1616  ;;  %v472_v8 = vadd.f32 1.0, %v1615_v6 }
  0xa9   : > { %1628 = vrcp.f32 %v471_v5  ;;  %v473_v10 = vadd.f32 1.0, %v1617_v7 }
  0xaa   : > { %1630 = vrcp.f32 %v472_v8 }
  0xad   : > { %v1619_v9 = vpop.eup %1618 }
  0xae   : > { %v474_v11 = vadd.f32 1.0, %v1619_v9  ;;  %v1621_v12 = vpop.eup %1620 }
  0xaf   : > { %v1623_v13 = vpop.eup %1622  ;;  %v1747_v18 = vmul.f32 %v1621_v12, %v1728_v21 }
  0xb0   : > { %1632 = vrcp.f32 %v474_v11  ;;  %v1625_v14 = vpop.eup %1624  ;;  %v475_v15 = vadd.f32 1.0, %v1623_v13 }
  0xb1   : > { %1634 = vrcp.f32 %v473_v10  ;;  %v1753_v20 = vmul.f32 %v1625_v14, %v1730_v22 }
  0xb2   : > { %v1627_v16 = vpop.eup %1626  ;;  %1636 = vrcp.f32 %v475_v15 }
  0xb3   : > { %v1629_v17 = vpop.eup %1628  ;;  %v1750_v19 = vmul.f32 %v1627_v16, %v1734_v34 }
  0xb4   : > { %v1756_v23 = vmul.f32 %v1629_v17, %v1736_v35  ;;  %v1631_v21 = vpop.eup %1630 }
  0xb5   : > { %v1438_v24 = vpack.i.bf16 %v1750_v19, %v1747_v18  ;;  %v680_v22 = vpack.c.bf16 %v1750_v19, %v1747_v18  ;;  %v1767_v29 = vmul.f32 %v1631_v21, %v1740_v43  ;;  %v325_v43 = vlaneseq }
  0xb6   : > { %v1443_v25 = vpack.i.bf16 %v1756_v23, %v1753_v20  ;;  %v681_v26 = vpack.c.bf16 %v1756_v23, %v1753_v20 }
  0xb7   : > { %1439 = vrot.lane.b32.xlu0 %v1438_v24, %s1647_s18 }
  0xb8   : > { %1444 = vrot.lane.b32.xlu1 %v1443_v25, %s1647_s18 }
  0xba   : > { %v1633_v27 = vpop.eup %1632 }
  0xbb   : > { %v1635_v28 = vpop.eup %1634  ;;  %v1769_v30 = vmul.f32 %v1633_v27, %v442_v55 }
  0xbc   : > { %v1637_v31 = vpop.eup %1636  ;;  %v1774_v33 = vmul.f32 %v1635_v28, %v1742_v44  ;;  %v1799_v44 = vand.u32 127, %v325_v43 }
  0xbd   : > { %v1448_v32 = vpack.i.bf16 %v1769_v30, %v1767_v29  ;;  %v1776_v34 = vmul.f32 %v1637_v31, %v443_v56  ;;  %v682_v35 = vpack.c.bf16 %v1769_v30, %v1767_v29 }
  0xbe   : > { %v1802_v45 = vadd.s32 128, %v1799_v44  ;;  %v332_v46 = vand.u32 15, %v1799_v44  ;;  %vm352_vm0 = vcmp.ge.s32.totalorder %v1799_v44, 16  ;;  %vm516_vm3 = vcmp.lt.s32.totalorder %v1799_v44, 17 }
  0xbf   : > { %1449 = vrot.lane.b32.xlu0 %v1448_v32, %s1647_s18  ;;  %v1453_v36 = vpack.i.bf16 %v1776_v34, %v1774_v33  ;;  %v683_v37 = vpack.c.bf16 %v1776_v34, %v1774_v33  ;;  %vm561_vm7 = vcmp.lt.s32.totalorder %v1799_v44, 16  ;;  %vm1878_vm8 = vmpackc.low %vm352_vm0, %vm352_vm0  ;;  %vm606_vm10 = vcmp.lt.s32.totalorder %v1799_v44, 15 }
  0xc0   : > { %v339_v47 = vand.u32 15, %v1802_v45  ;;  %vm1807_vm1 = vcmp.ge.s32.totalorder %v332_v46, 1  ;;  %vm1882_vm9 = vcmp.le.s32.totalorder %v332_v46, 14  ;;  %vm651_vm15 = vcmp.lt.s32.totalorder %v1799_v44, 1 }
  0xc1   : > { %1454 = vrot.lane.b32.xlu1 %v1453_v36, %s1647_s18  ;;  %vm1822_vm4 = vmand %vm352_vm0, %vm1807_vm1 }
  0xc2   : > { %vm1813_vm2 = vcmp.ge.s32.totalorder %v339_v47, 1  ;;  %vm1322_vm6 = vmpackc.low %vm1822_vm4, %vm1822_vm4  ;;  %vm1899_vm11 = vcmp.le.s32.totalorder %v339_v47, 14  ;;  %vm355_vm4 = vcmp.lt.s32.totalorder %v1802_v45, 240 }
  0xc3   : > { %1459 = vrot.lane.b32.xlu0 %v1438_v24, %s1648_s19  ;;  %vm1833_vm5 = vmpackc.low %vm1813_vm2, %vm1813_vm2 }
  0xc4   : > { %vm1907_vm12 = vmand %vm352_vm0, %vm1882_vm9 }
  0xc5   : > { %1464 = vrot.lane.b32.xlu1 %v1443_v25, %s1648_s19  ;;  %vm1924_vm13 = vmpackc.low %vm1899_vm11, %vm1899_vm11 }
  0xc6   : > { %vm1340_vm14 = vmpackc.low %vm1907_vm12, %vm1907_vm12  ;;  %vm966_vm12 = vcmask 261120  }
  0xc7   : > { %1469 = vrot.lane.b32.xlu0 %v1448_v32, %s1648_s19  ;;  %vm1965_vm0 = vmpackc.low %vm1807_vm1, %vm1807_vm1  ;;  %vm704_vm1 = vcmp.lt.s32.totalorder %v1799_v44, 127 }
  0xc9   : > { %1474 = vrot.lane.b32.xlu1 %v1453_v36, %s1648_s19 }
  0xcb   : > { %1479 = vrot.lane.b32.xlu0 %v1438_v24, %s1649_s20 }
  0xcd   : > { %1484 = vrot.lane.b32.xlu1 %v1443_v25, %s1649_s20 }
  0xcf   : > { %1489 = vrot.lane.b32.xlu0 %v1448_v32, %s1649_s20 }
  0xd1   : > { %1494 = vrot.lane.b32.xlu1 %v1453_v36, %s1649_s20 }
  0xd3   : > { %1499 = vrot.lane.b32.xlu0 %v1438_v24, %s1650_s21 }
  0xd5   : > { %1504 = vrot.lane.b32.xlu1 %v1443_v25, %s1650_s21 }
  0xd7   : > { %1509 = vrot.lane.b32.xlu0 %v1448_v32, %s1650_s21 }
  0xd9   : > { %1514 = vrot.lane.b32.xlu1 %v1453_v36, %s1650_s21 }
  0xdb   : > { %1519 = vrot.lane.b32.xlu0 %v1438_v24, %s1651_s22 }
  0xdd   : > { %1524 = vrot.lane.b32.xlu1 %v1443_v25, %s1651_s22 }
  0xdf   : > { %1529 = vrot.lane.b32.xlu0 %v1448_v32, %s1651_s22 }
  0xe1   : > { %1534 = vrot.lane.b32.xlu1 %v1453_v36, %s1651_s22 }
  0xe3   : > { %1539 = vrot.lane.b32.xlu0 %v1438_v24, %s1652_s23 }
  0xe5   : > { %1544 = vrot.lane.b32.xlu1 %v1443_v25, %s1652_s23 }
  0xe7   : > { %1549 = vrot.lane.b32.xlu0 %v1448_v32, %s1652_s23 }
  0xe9   : > { %1554 = vrot.lane.b32.xlu1 %v1453_v36, %s1652_s23 }
  0xeb   : > { %1559 = vrot.lane.b32.xlu0 %v1438_v24, %s1653_s25 }
  0xed   : > { %1564 = vrot.lane.b32.xlu1 %v1443_v25, %s1653_s25 }
  0xef   : > { %1569 = vrot.lane.b32.xlu0 %v1438_v24, %s1654_s26 }
  0xf1   : > { %1574 = vrot.lane.b32.xlu1 %v1443_v25, %s1654_s26 }
  0xf3   : > { %1579 = vrot.lane.b32.xlu0 %v1448_v32, %s1653_s25 }
  0xf5   : > { %1584 = vrot.lane.b32.xlu1 %v1453_v36, %s1653_s25 }
  0xf7   : > { %1589 = vrot.lane.b32.xlu0 %v1448_v32, %s1654_s26 }
  0xf9   : > { %1594 = vrot.lane.b32.xlu1 %v1453_v36, %s1654_s26 }
  0xfb   : > { %918 = vperm.xlu0 %1436, %v912_v39  }
  0xfd   : > { %923 = vperm.xlu1 %1437, %v913_v40  }
  0xff   : > { %928 = vperm.xlu0 %1436, %v914_v41  }
 0x101   : > { %933 = vperm.xlu1 %1437, %v915_v42  }
 0x129   : > { %v1440_v49 = vpop.permute.xlu0 %1439 }
 0x12a   : > { %v1445_v50 = vpop.permute.xlu1 %1444  ;;  %v1442_v51 = vunpack.i.h.bf16 %v1440_v49  ;;  %v1441_v52 = vunpack.i.l.bf16 %v1440_v49 }
 0x12b   : > { %v1447_v54 = vunpack.i.h.bf16 %v1445_v50  ;;  %v1446_v55 = vunpack.i.l.bf16 %v1445_v50 }
 0x12d   : > { %v517_v57 = vsel %vm516_vm3, %v1441_v52, %v1446_v55  ;;  %v518_v58 = vsel %vm516_vm3, %v1442_v51, %v1447_v54  ;;  %v521_v60 = vsel %vm516_vm3, %v1446_v55, %v1441_v52  ;;  %v522_v61 = vsel %vm516_vm3, %v1447_v54, %v1442_v51 }
 0x12e   : > { %v1320_v62 = vpack.c.bf16 %v518_v58, %v517_v57  ;;  %v1323_v63 = vpack.c.bf16 %v522_v61, %v521_v60 }
 0x130   : > { %1321 = vmatprep.subr.msk.bf16.mxu1 %vm1833_vm5, %v1320_v62 }
 0x131   : > { %1324 = vmatpush1.bf16.msk.msra.mxu1 %vm1322_vm6, %v1323_v63  ;;  %v1450_v0 = vpop.permute.xlu0 %1449 }
 0x132   : > { %v1452_v2 = vunpack.i.h.bf16 %v1450_v0  ;;  %v1451_v3 = vunpack.i.l.bf16 %v1450_v0 }
 0x133   : > { %v1455_v4 = vpop.permute.xlu1 %1454 }
 0x134   : > { %v1457_v5 = vunpack.i.h.bf16 %v1455_v4  ;;  %v1456_v6 = vunpack.i.l.bf16 %v1455_v4 }
 0x135   : > { %v1460_v7 = vpop.permute.xlu0 %1459 }
 0x136   : > { %v1462_v8 = vunpack.i.h.bf16 %v1460_v7  ;;  %v1461_v9 = vunpack.i.l.bf16 %v1460_v7  ;;  %v520_v10 = vsel %vm516_vm3, %v1452_v2, %v1457_v5  ;;  %v524_v11 = vsel %vm516_vm3, %v1457_v5, %v1452_v2 }
 0x137   : > { %v519_v12 = vsel %vm516_vm3, %v1451_v3, %v1456_v6  ;;  %v523_v13 = vsel %vm516_vm3, %v1456_v6, %v1451_v3  ;;  %v1465_v16 = vpop.permute.xlu1 %1464  ;;  %vm749_vm3 = vcmp.lt.s32.totalorder %v1799_v44, 113 }
 0x138   : > { %v1326_v14 = vpack.c.bf16 %v520_v10, %v519_v12  ;;  %v1329_v15 = vpack.c.bf16 %v524_v11, %v523_v13  ;;  %v1467_v17 = vunpack.i.h.bf16 %v1465_v16  ;;  %v1466_v24 = vunpack.i.l.bf16 %v1465_v16 }
 0x139   : > { %v1470_v25 = vpop.permute.xlu0 %1469 }
 0x13a   : > { %1327 = vmatprep.subr.msk.bf16.mxu1 %vm1833_vm5, %v1326_v14  ;;  %v1472_v21 = vunpack.i.h.bf16 %v1470_v25  ;;  %v1471_v27 = vunpack.i.l.bf16 %v1470_v25  ;;  %v567_v28 = vsel %vm561_vm7, %v1467_v17, %v1462_v8  ;;  %v566_v31 = vsel %vm561_vm7, %v1466_v24, %v1461_v9 }
 0x13b   : > { %1330 = vmatpush1.bf16.msk.msra.mxu1 %vm1322_vm6, %v1329_v15  ;;  %v562_v32 = vsel %vm561_vm7, %v1461_v9, %v1466_v24  ;;  %v563_v36 = vsel %vm561_vm7, %v1462_v8, %v1467_v17  ;;  %v1332_v38 = vpack.c.bf16 %v567_v28, %v566_v31  ;;  %v1475_v39 = vpop.permute.xlu1 %1474  ;;  %vm2033_vm6 = vmand %vm355_vm4, %vm1813_vm2 }
 0x13c   : > { %v583_v40 = vpack.c.bf16 %v563_v36, %v562_v32  ;;  %v1477_v42 = vunpack.i.h.bf16 %v1475_v39  ;;  %v1476_v43 = vunpack.i.l.bf16 %v1475_v39  ;;  %vm1373_vm2 = vmpackc.low %vm2033_vm6, %vm2033_vm6 }
 0x13d   : > { %v1480_v49 = vpop.permute.xlu0 %1479 }
 0x13e   : > { %977 = vmatprep.subr.bf16.mxu1 %v583_v40  ;;  %v1482_v50 = vunpack.i.h.bf16 %v1480_v49  ;;  %v1481_v51 = vunpack.i.l.bf16 %v1480_v49  ;;  %v569_v54 = vsel %vm561_vm7, %v1477_v42, %v1472_v21  ;;  %v568_v55 = vsel %vm561_vm7, %v1476_v43, %v1471_v27 }
 0x13f   : > { %1333 = vmatpush1.bf16.msk.msra.mxu1 %vm1878_vm8, %v1332_v38  ;;  %v564_v56 = vsel %vm561_vm7, %v1471_v27, %v1476_v43  ;;  %v565_v57 = vsel %vm561_vm7, %v1472_v21, %v1477_v42  ;;  %v1335_v58 = vpack.c.bf16 %v569_v54, %v568_v55  ;;  %v1485_v46 = vpop.permute.xlu1 %1484  ;;  %vm794_vm7 = vcmp.lt.s32.totalorder %v1799_v44, 112 }
 0x140   : > { %v585_v60 = vpack.c.bf16 %v565_v57, %v564_v56  ;;  %v1487_v62 = vunpack.i.h.bf16 %v1485_v46  ;;  %v1486_v63 = vunpack.i.l.bf16 %v1485_v46 }
 0x141   : > { %v1490_v0 = vpop.permute.xlu0 %1489 }
 0x142   : > { %979 = vmatprep.subr.bf16.mxu1 %v585_v60  ;;  %v1492_v3 = vunpack.i.h.bf16 %v1490_v0  ;;  %v1491_v4 = vunpack.i.l.bf16 %v1490_v0  ;;  %v608_v47 = vsel %vm606_vm10, %v1482_v50, %v1487_v62  ;;  %v612_v5 = vsel %vm606_vm10, %v1487_v62, %v1482_v50 }
 0x143   : > { %v607_v6 = vsel %vm606_vm10, %v1481_v51, %v1486_v63  ;;  %v611_v7 = vsel %vm606_vm10, %v1486_v63, %v1481_v51  ;;  %1336 = vmatpush1.bf16.msk.msra.mxu1 %vm1878_vm8, %v1335_v58  ;;  %v1495_v11 = vpop.permute.xlu1 %1494  ;;  %vm2066_vm8 = vmand %vm355_vm4, %vm1899_vm11 }
 0x144   : > { %v1338_v9 = vpack.c.bf16 %v608_v47, %v607_v6  ;;  %v1341_v10 = vpack.c.bf16 %v612_v5, %v611_v7  ;;  %v1497_v12 = vunpack.i.h.bf16 %v1495_v11  ;;  %v1496_v13 = vunpack.i.l.bf16 %v1495_v11  ;;  %vm2098_vm11 = vmpackc.low %vm355_vm4, %vm355_vm4 }
 0x145   : > { %v1500_v14 = vpop.permute.xlu0 %1499 }
 0x146   : > { %1339 = vmatprep.subr.msk.bf16.mxu1 %vm1924_vm13, %v1338_v9  ;;  %v1502_v15 = vunpack.i.h.bf16 %v1500_v14  ;;  %v1501_v16 = vunpack.i.l.bf16 %v1500_v14  ;;  %v610_v17 = vsel %vm606_vm10, %v1492_v3, %v1497_v12  ;;  %v614_v24 = vsel %vm606_vm10, %v1497_v12, %v1492_v3 }
 0x147   : > { %v609_v25 = vsel %vm606_vm10, %v1491_v4, %v1496_v13  ;;  %v613_v21 = vsel %vm606_vm10, %v1496_v13, %v1491_v4  ;;  %1342 = vmatpush1.bf16.msk.msra.mxu1 %vm1340_vm14, %v1341_v10  ;;  %v1505_v31 = vpop.permute.xlu1 %1504  ;;  %vm1391_vm10 = vmpackc.low %vm2066_vm8, %vm2066_vm8 }
 0x148   : > { %v1344_v27 = vpack.c.bf16 %v610_v17, %v609_v25  ;;  %v1347_v28 = vpack.c.bf16 %v614_v24, %v613_v21  ;;  %v1507_v32 = vunpack.i.h.bf16 %v1505_v31  ;;  %v1506_v36 = vunpack.i.l.bf16 %v1505_v31 }
 0x149   : > { %v1510_v38 = vpop.permute.xlu0 %1509 }
 0x14a   : > { %1345 = vmatprep.subr.msk.bf16.mxu1 %vm1924_vm13, %v1344_v27  ;;  %v1512_v39 = vunpack.i.h.bf16 %v1510_v38  ;;  %v1511_v40 = vunpack.i.l.bf16 %v1510_v38  ;;  %v653_v41 = vsel %vm651_vm15, %v1502_v15, %v1507_v32  ;;  %v657_v42 = vsel %vm651_vm15, %v1507_v32, %v1502_v15  ;;  %v1598_v38 = vld [vmem:[%s2190_s3] ss:$12 sps:$4 sm:$0xff]  }
 0x14b   : > { %v652_v43 = vsel %vm651_vm15, %v1501_v16, %v1506_v36  ;;  %v656_v49 = vsel %vm651_vm15, %v1506_v36, %v1501_v16  ;;  %1348 = vmatpush1.bf16.msk.msra.mxu1 %vm1340_vm14, %v1347_v28  ;;  %v1515_v54 = vpop.permute.xlu1 %1514 }
 0x14c   : > { %v1350_v50 = vpack.c.bf16 %v653_v41, %v652_v43  ;;  %v1353_v51 = vpack.c.bf16 %v657_v42, %v656_v49  ;;  %v1517_v56 = vunpack.i.h.bf16 %v1515_v54  ;;  %v1516_v57 = vunpack.i.l.bf16 %v1515_v54 }
 0x14d   : > { %v1520_v58 = vpop.permute.xlu0 %1519 }
 0x14e   : > { %1351 = vmatprep.subr.msk.bf16.mxu1 %vm1833_vm5, %v1350_v50  ;;  %v655_v46 = vsel %vm651_vm15, %v1512_v39, %v1517_v56  ;;  %v659_v60 = vsel %vm651_vm15, %v1517_v56, %v1512_v39  ;;  %v654_v48 = vsel %vm651_vm15, %v1511_v40, %v1516_v57  ;;  %v658_v62 = vsel %vm651_vm15, %v1516_v57, %v1511_v40 }
 0x14f   : > { %1354 = vmatpush1.bf16.msk.msra.mxu1 %vm1965_vm0, %v1353_v51  ;;  %v1356_v63 = vpack.c.bf16 %v655_v46, %v654_v48  ;;  %v1359_v0 = vpack.c.bf16 %v659_v60, %v658_v62  ;;  %v1525_v2 = vpop.permute.xlu1 %1524  ;;  %v1522_v5 = vunpack.i.h.bf16 %v1520_v58  ;;  %v1521_v6 = vunpack.i.l.bf16 %v1520_v58 }
 0x150   : > { %v1527_v4 = vunpack.i.h.bf16 %v1525_v2  ;;  %v1526_v47 = vunpack.i.l.bf16 %v1525_v2 }
 0x151   : > { %v1530_v3 = vpop.permute.xlu0 %1529  ;;  %1357 = vmatprep.subr.msk.bf16.mxu1 %vm1833_vm5, %v1356_v63  ;;  %vm2019_vm5 = vmpackc.low %vm1882_vm9, %vm1882_vm9  ;;  %vm839_vm9 = vcmp.lt.s32.totalorder %v1799_v44, 111  ;;  %v1601_v44 = vld [vmem:[%s2190_s3 + $0x8] ss:$12 sps:$4 sm:$0xff]  }
 0x152   : > { %v1532_v9 = vunpack.i.h.bf16 %v1530_v3  ;;  %v1531_v10 = vunpack.i.l.bf16 %v1530_v3  ;;  %v710_v12 = vsel %vm704_vm1, %v1527_v4, %v1522_v5  ;;  %v709_v59 = vsel %vm704_vm1, %v1526_v47, %v1521_v6 }
 0x153   : > { %1360 = vmatpush1.bf16.msk.msra.mxu1 %vm1965_vm0, %v1359_v0  ;;  %v1535_v7 = vpop.permute.xlu1 %1534  ;;  %v706_v15 = vsel %vm704_vm1, %v1522_v5, %v1527_v4  ;;  %v705_v23 = vsel %vm704_vm1, %v1521_v6, %v1526_v47 }
 0x154   : > { %989 = vmatprep.subr.bf16.mxu1 %v681_v26  ;;  %v1537_v13 = vunpack.i.h.bf16 %v1535_v7  ;;  %v1536_v14 = vunpack.i.l.bf16 %v1535_v7  ;;  %v1362_v26 = vpack.c.bf16 %v710_v12, %v709_v59  ;;  %v1365_v33 = vpack.c.bf16 %v706_v15, %v705_v23 }
 0x155   : > { %v1540_v11 = vpop.permute.xlu0 %1539 }
 0x156   : > { %v1542_v16 = vunpack.i.h.bf16 %v1540_v11  ;;  %v1541_v17 = vunpack.i.l.bf16 %v1540_v11  ;;  %v712_v25 = vsel %vm704_vm1, %v1537_v13, %v1532_v9  ;;  %v711_v18 = vsel %vm704_vm1, %v1536_v14, %v1531_v10 }
 0x157   : > { %990 = vmatpush1.bf16.msra.mxu1 %v680_v22  ;;  %v1545_v20 = vpop.permute.xlu1 %1544  ;;  %v708_v34 = vsel %vm704_vm1, %v1532_v9, %v1537_v13  ;;  %v707_v29 = vsel %vm704_vm1, %v1531_v10, %v1536_v14  ;;  %v1368_v30 = vpack.c.bf16 %v712_v25, %v711_v18 }
 0x158   : > { %991 = vmatprep.subr.bf16.mxu1 %v683_v37  ;;  %v1547_v19 = vunpack.i.h.bf16 %v1545_v20  ;;  %v1546_v22 = vunpack.i.l.bf16 %v1545_v20  ;;  %v1371_v39 = vpack.c.bf16 %v708_v34, %v707_v29 }
 0x159   : > { %v1550_v24 = vpop.permute.xlu0 %1549 }
 0x15a   : > { %v1551_v27 = vunpack.i.l.bf16 %v1550_v24  ;;  %v755_v31 = vsel %vm749_vm3, %v1547_v19, %v1542_v16  ;;  %v754_v32 = vsel %vm749_vm3, %v1546_v22, %v1541_v17  ;;  %v751_v40 = vsel %vm749_vm3, %v1542_v16, %v1547_v19 }
 0x15b   : > { %992 = vmatpush1.bf16.msra.mxu1 %v682_v35  ;;  %v1555_v37 = vpop.permute.xlu1 %1554  ;;  %v1552_v35 = vunpack.i.h.bf16 %v1550_v24  ;;  %v750_v53 = vsel %vm749_vm3, %v1541_v17, %v1546_v22  ;;  %v1374_v42 = vpack.c.bf16 %v755_v31, %v754_v32 }
 0x15c   : > { %1363 = vmatprep.subr.msk.bf16.mxu1 %vm1924_vm13, %v1362_v26  ;;  %v1557_v36 = vunpack.i.h.bf16 %v1555_v37  ;;  %v1556_v52 = vunpack.i.l.bf16 %v1555_v37  ;;  %v1377_v46 = vpack.c.bf16 %v751_v40, %v750_v53  ;;  %v1604_v40 = vld [vmem:[%s2190_s3 + $0x18] ss:$12 sps:$4 sm:$0xff]  }
 0x15d   : > { %v1560_v28 = vpop.permute.xlu0 %1559 }
 0x15e   : > { %v1562_v43 = vunpack.i.h.bf16 %v1560_v28  ;;  %v1561_v49 = vunpack.i.l.bf16 %v1560_v28  ;;  %v757_v51 = vsel %vm749_vm3, %v1557_v36, %v1552_v35  ;;  %v756_v54 = vsel %vm749_vm3, %v1556_v52, %v1551_v27 }
 0x15f   : > { %1366 = vmatpush1.bf16.msk.msra.mxu1 %vm2019_vm5, %v1365_v33  ;;  %v1565_v41 = vpop.permute.xlu1 %1564  ;;  %v753_v60 = vsel %vm749_vm3, %v1552_v35, %v1557_v36  ;;  %v752_v63 = vsel %vm749_vm3, %v1551_v27, %v1556_v52  ;;  %v1380_v0 = vpack.c.bf16 %v757_v51, %v756_v54 }
 0x160   : > { %1369 = vmatprep.subr.msk.bf16.mxu1 %vm1924_vm13, %v1368_v30  ;;  %v1567_v56 = vunpack.i.h.bf16 %v1565_v41  ;;  %v1566_v8 = vunpack.i.l.bf16 %v1565_v41  ;;  %v1383_v14 = vpack.c.bf16 %v753_v60, %v752_v63  ;;  %v1605_v41 = vld [vmem:[%s2190_s3 + $0x20] ss:$12 sps:$4 sm:$0xff]   ;;  %vm1119_vm13 = vcmask 7168  }
 0x161   : > { %v1570_v50 = vpop.permute.xlu0 %1569 }
 0x162   : > { %v1572_v57 = vunpack.i.h.bf16 %v1570_v50  ;;  %v1571_v58 = vunpack.i.l.bf16 %v1570_v50  ;;  %v800_v47 = vsel %vm794_vm7, %v1567_v56, %v1562_v43  ;;  %v799_v61 = vsel %vm794_vm7, %v1566_v8, %v1561_v49 }
 0x163   : > { %1372 = vmatpush1.bf16.msk.msra.mxu1 %vm2019_vm5, %v1371_v39  ;;  %v1575_v48 = vpop.permute.xlu1 %1574  ;;  %v1386_v16 = vpack.c.bf16 %v800_v47, %v799_v61  ;;  %v795_v17 = vsel %vm794_vm7, %v1561_v49, %v1566_v8  ;;  %v796_v24 = vsel %vm794_vm7, %v1562_v43, %v1567_v56  ;;  %v1602_v39 = vld [vmem:[%s2190_s3 + $0x1c] ss:$12 sps:$4 sm:$0xff]  }
 0x164   : > { %1375 = vmatprep.subr.msk.bf16.mxu1 %vm1373_vm2, %v1374_v42  ;;  %v1577_v2 = vunpack.i.h.bf16 %v1575_v48  ;;  %v1576_v3 = vunpack.i.l.bf16 %v1575_v48  ;;  %v815_v37 = vpack.c.bf16 %v796_v24, %v795_v17 }
 0x165   : > { %v1580_v4 = vpop.permute.xlu0 %1579 }
 0x166   : > { %v1582_v5 = vunpack.i.h.bf16 %v1580_v4  ;;  %v1581_v6 = vunpack.i.l.bf16 %v1580_v4  ;;  %v844_v7 = vsel %vm839_vm9, %v1576_v3, %v1571_v58  ;;  %v845_v9 = vsel %vm839_vm9, %v1577_v2, %v1572_v57 }
 0x167   : > { %1378 = vmatpush1.bf16.msk.msra.mxu1 %vm1965_vm0, %v1377_v46  ;;  %v840_v10 = vsel %vm839_vm9, %v1571_v58, %v1576_v3  ;;  %v841_v11 = vsel %vm839_vm9, %v1572_v57, %v1577_v2  ;;  %v1585_v12 = vpop.permute.xlu1 %1584  ;;  %v1392_v59 = vpack.c.bf16 %v845_v9, %v844_v7 }
 0x168   : > { %1381 = vmatprep.subr.msk.bf16.mxu1 %vm1373_vm2, %v1380_v0  ;;  %v1395_v13 = vpack.c.bf16 %v841_v11, %v840_v10  ;;  %v1587_v15 = vunpack.i.h.bf16 %v1585_v12  ;;  %v1586_v20 = vunpack.i.l.bf16 %v1585_v12 }
 0x169   : > { %v1590_v23 = vpop.permute.xlu0 %1589  ;;  %1393 = vmatprep.subr.msk.bf16.mxu0 %vm1391_vm10, %v1392_v59 }
 0x16a   : > { %v802_v45 = vsel %vm794_vm7, %v1587_v15, %v1582_v5  ;;  %v801_v25 = vsel %vm794_vm7, %v1586_v20, %v1581_v6  ;;  %1396 = vmatpush1.bf16.msk.msra.mxu0 %vm2019_vm5, %v1395_v13  ;;  %v1592_v18 = vunpack.i.h.bf16 %v1590_v23  ;;  %v1591_v19 = vunpack.i.l.bf16 %v1590_v23 }
 0x16b   : > { %1384 = vmatpush1.bf16.msk.msra.mxu1 %vm1965_vm0, %v1383_v14  ;;  %v1595_v22 = vpop.permute.xlu1 %1594  ;;  %v1389_v29 = vpack.c.bf16 %v802_v45, %v801_v25  ;;  %v797_v30 = vsel %vm794_vm7, %v1581_v6, %v1586_v20  ;;  %v798_v55 = vsel %vm794_vm7, %v1582_v5, %v1587_v15 }
 0x16c   : > { %1387 = vmatprep.subr.msk.bf16.mxu1 %vm2098_vm11, %v1386_v16  ;;  %v1597_v33 = vunpack.i.h.bf16 %v1595_v22  ;;  %v1596_v34 = vunpack.i.l.bf16 %v1595_v22  ;;  %v817_v52 = vpack.c.bf16 %v798_v55, %v797_v30 }
 0x16e   : > { %v843_v35 = vsel %vm839_vm9, %v1592_v18, %v1597_v33  ;;  %v847_v27 = vsel %vm839_vm9, %v1597_v33, %v1592_v18  ;;  %v842_v28 = vsel %vm839_vm9, %v1591_v19, %v1596_v34  ;;  %v846_v31 = vsel %vm839_vm9, %v1596_v34, %v1591_v19 }
 0x16f   : > { %1002 = vmatpush1.bf16.msra.mxu1 %v815_v37  ;;  %v1398_v32 = vpack.c.bf16 %v847_v27, %v846_v31  ;;  %v1401_v36 = vpack.c.bf16 %v843_v35, %v842_v28 }
 0x170   : > { %1390 = vmatprep.subr.msk.bf16.mxu1 %vm2098_vm11, %v1389_v29 }
 0x171   : > { %1399 = vmatprep.subr.msk.bf16.mxu0 %vm1391_vm10, %v1398_v32 }
 0x172   : > { %1402 = vmatpush1.bf16.msk.msra.mxu0 %vm2019_vm5, %v1401_v36 }
 0x173   : > { %1004 = vmatpush1.bf16.msra.mxu1 %v817_v52 }
 0x175   : > { %1302 = vmatmul.mubr.msk.bf16.vlgmr.msra.gmra.mrb[0].mxu0 %vm966_vm12, %v1601_v44 }
 0x176   : > { %1006 = vmatmul.mubr.bf16.vlgmr.msra.gmra.mrb[0].mxu1 %v1598_v38  ;;  %1068 = vmatprep.mubr.bf16.mxu0 %v1646_v1 }
 0x177   : > { %1015 = vmatprep.mubr.bf16.mxu1 %v1602_v39 }
 0x17a   : > { %v919_v53 = vpop.permute.xlu0 %918 }
 0x17c   : > { %v924_v21 = vpop.permute.xlu1 %923 }
 0x17d   : > { %1303 = vmatmul.mubr.msk.bf16.gmra.mrb[4].mxu0 %vm966_vm12, %v1605_v41 }
 0x17e   : > { %1016 = vmatmul.mubr.bf16.gmra.mrb[4].mxu1 %v1604_v40  ;;  %v929_v61 = vpop.permute.xlu0 %928 }
 0x180   : > { %v934_v47 = vpop.permute.xlu1 %933 }
 0x248   : > { %v1060_v43 = vpop.f32.mrb[0].mxu0 }
 0x249   : > { %v1007_v42 = vpop.f32.mrb[0].mxu1  ;;  %v1062_v51 = vpop.f32.mrb[1].mxu0 }
 0x24a   : > { %v1008_v49 = vadd.f32 %v1007_v42, %v919_v53  ;;  %v1009_v50 = vpop.f32.mrb[1].mxu1  ;;  %v1064_v56 = vpop.f32.mrb[2].mxu0 }
 0x24b   : > { %v1010_v54 = vadd.f32 %v1009_v50, %v919_v53  ;;  %v1011_v1 = vpop.f32.mrb[2].mxu1  ;;  %v1066_v46 = vpop.f32.mrb[3].mxu0 }
 0x24c   : > { %v1061_v8 = vadd.f32 %v1060_v43, %v1008_v49  ;;  %v1012_v57 = vadd.f32 %v1011_v1, %v924_v21  ;;  %v1013_v58 = vpop.f32.mrb[3].mxu1 }
 0x24d   : > { %v1063_v60 = vadd.f32 %v1062_v51, %v1010_v54  ;;  %v1014_v48 = vadd.f32 %v1013_v58, %v924_v21 }
 0x24e   : > { %v1065_v62 = vadd.f32 %v1064_v56, %v1012_v57  ;;  %v1124_v63 = vmul.f32 %v1061_v8, %v1061_v8 }
 0x24f   : > { %v1315_v0 = vpack.c.bf16 %v1063_v60, %v1061_v8  ;;  %v1067_v2 = vadd.f32 %v1066_v46, %v1014_v48  ;;  %v1107_v3 = vadd.f32 %v1063_v60, %v1061_v8  ;;  %v1125_v4 = vmul.f32 %v1063_v60, %v1063_v60 }
 0x250   : > { %v1126_v5 = vmul.f32 %v1065_v62, %v1065_v62  ;;  %v1070_v9 = vpop.f32.mrb[4].mxu0 }
 0x251   : > { %1103 = vst [vmem:[%s2162_s28] sm:$0xff] %v1315_v0  ;;  %v1316_v6 = vpack.c.bf16 %v1067_v2, %v1065_v62  ;;  %v1017_v7 = vpop.f32.mrb[4].mxu1  ;;  %1108 = vadd.xlane.f32.xlu0 %v1107_v3  ;;  %v1110_v10 = vadd.f32 %v1067_v2, %v1065_v62  ;;  %v1127_v11 = vmul.f32 %v1067_v2, %v1067_v2  ;;  %v1072_v14 = vpop.f32.mrb[5].mxu0 }
 0x252   : > { %v1132_v12 = vadd.f32 %v1125_v4, %v1124_v63  ;;  %v1018_v59 = vadd.f32 %v1017_v7, %v929_v61  ;;  %v1019_v13 = vpop.f32.mrb[5].mxu1  ;;  %v1074_v23 = vpop.f32.mrb[6].mxu0 }
 0x253   : > { %1104 = vst [vmem:[%s2162_s28 + $0x8] sm:$0xff] %v1316_v6  ;;  %v1020_v15 = vadd.f32 %v1019_v13, %v929_v61  ;;  %v1021_v20 = vpop.f32.mrb[6].mxu1  ;;  %1111 = vadd.xlane.f32.xlu1 %v1110_v10  ;;  %v1135_v26 = vadd.f32 %v1127_v11, %v1126_v5  ;;  %v1076_v45 = vpop.f32.mrb[7].mxu0 }
 0x254   : > { %v1071_v16 = vadd.f32 %v1070_v9, %v1018_v59  ;;  %v1022_v17 = vadd.f32 %v1021_v20, %v934_v47  ;;  %v1023_v24 = vpop.f32.mrb[7].mxu1 }
 0x255   : > { %v1073_v25 = vadd.f32 %v1072_v14, %v1020_v15  ;;  %v1024_v18 = vadd.f32 %v1023_v24, %v934_v47  ;;  %1136 = vadd.xlane.f32.xlu0 %v1135_v26 }
 0x256   : > { %v1075_v19 = vadd.f32 %v1074_v23, %v1022_v17  ;;  %v1128_v22 = vmul.f32 %v1071_v16, %v1071_v16 }
 0x257   : > { %v1317_v33 = vpack.c.bf16 %v1073_v25, %v1071_v16  ;;  %v1077_v34 = vadd.f32 %v1076_v45, %v1024_v18  ;;  %1133 = vadd.xlane.f32.xlu1 %v1132_v12  ;;  %v1113_v37 = vadd.f32 %v1073_v25, %v1071_v16  ;;  %v1129_v29 = vmul.f32 %v1073_v25, %v1073_v25 }
 0x258   : > { %v1130_v30 = vmul.f32 %v1075_v19, %v1075_v19 }
 0x259   : > { %1105 = vst [vmem:[%s2162_s28 + $0x10] sm:$0xff] %v1317_v33  ;;  %v1318_v55 = vpack.c.bf16 %v1077_v34, %v1075_v19  ;;  %1114 = vadd.xlane.f32.xlu0 %v1113_v37  ;;  %v1138_v35 = vadd.f32 %v1129_v29, %v1128_v22  ;;  %v1116_v27 = vadd.f32 %v1077_v34, %v1075_v19 }
 0x25a   : > { %v1131_v28 = vmul.f32 %v1077_v34, %v1077_v34 }
 0x25b   : > { %1106 = vst [vmem:[%s2162_s28 + $0x18] sm:$0xff] %v1318_v55  ;;  %1139 = vadd.xlane.f32.xlu1 %v1138_v35 }
 0x25c   : > { %v1141_v31 = vadd.f32 %v1131_v28, %v1130_v30 }
 0x25d   : > { %1117 = vadd.xlane.f32.xlu0 %v1116_v27 }
 0x261   : > { %1142 = vadd.xlane.f32.xlu0 %v1141_v31 }
 0x2de   : > { %v1109_v32 = vpop.xlane.xlu0 %1108 }
 0x2df   : > { %1120 = vst.msk [vmem:[%s318_s9] sm:$0xff] %vm1119_vm13, %v1109_v32 }
 0x2e0   : > { %v1112_v36 = vpop.xlane.xlu1 %1111 }
 0x2e1   : > { %1121 = vst.msk [vmem:[%s318_s9 + $0x8] sm:$0xff] %vm1119_vm13, %v1112_v36 }
 0x2e2   : > { %v1137_v52 = vpop.xlane.xlu0 %1136 }
 0x2e3   : > { %1145 = vst.msk [vmem:[%s323_s12 + $0x8] sm:$0xff] %vm1119_vm13, %v1137_v52 }
 0x2e4   : > { %v1134_v38 = vpop.xlane.xlu1 %1133 }
 0x2e5   : > { %1144 = vst.msk [vmem:[%s323_s12] sm:$0xff] %vm1119_vm13, %v1134_v38 }
 0x2e6   : > { %v1115_v44 = vpop.xlane.xlu0 %1114 }
 0x2e7   : > { %1122 = vst.msk [vmem:[%s318_s9 + $0x10] sm:$0xff] %vm1119_vm13, %v1115_v44 }
 0x2e8   : > { %v1140_v39 = vpop.xlane.xlu1 %1139 }
 0x2e9   : > { %1146 = vst.msk [vmem:[%s323_s12 + $0x10] sm:$0xff] %vm1119_vm13, %v1140_v39 }
 0x2ea   : > { %v1118_v40 = vpop.xlane.xlu0 %1117 }
 0x2eb   : > { %1123 = vst.msk [vmem:[%s318_s9 + $0x18] sm:$0xff] %vm1119_vm13, %v1118_v40 }
 0x2ee   : > { %v1143_v41 = vpop.xlane.xlu0 %1142 }
 0x2ef   : > { %1147 = vst.msk [vmem:[%s323_s12 + $0x18] sm:$0xff] %vm1119_vm13, %v1143_v41 }
 0x2f0 PF: > { %s18_s24 = sadd.s32 1, %s1644_s24  }
 0x2f1   : > { %p15_p4 = scmp.ge.s32.totalorder %s18_s24, 4  }
 0x2f3   :  { %17 = sbr.rel (!%p15_p4) target bundleno = 1 (0x1), region = 97 }

</bundles_post_ra>
